<compile_context>
chip_gen: v6e
topology: v6e:2x2x1
jax: 0.10.0
libtpu: 0.0.40
codegen_flags: <defaults>
</compile_context>

<pallas_src>
import functools

import jax
import jax.numpy as jnp
from jax import lax
from jax.experimental import pallas as pl
from jax.experimental.pallas import tpu as pltpu

KMAX = 7          # max kernel size over scale=(1,3,5,7)
PAD = KMAX // 2   # = 3


def _dwconv7_kernel(x_ref, w_ref, b_ref, o_ref, xpad_ref, *, c):
    # x_ref   : (H, W*C)         lane-dense input, one batch element
    # w_ref   : (49, W*C)        per-tap weights, tiled across W
    # b_ref   : (1, W*C)         per-channel bias, tiled across W
    # o_ref   : (H, W*C)
    # xpad_ref: (H+6, (W+6)*C)   VMEM scratch holding the zero-halo image
    H, WC = o_ref.shape

    # Fused zero-pad: zero the halo scratch, drop the interior in at (+3, +3*C).
    xpad_ref[...] = jnp.zeros_like(xpad_ref)
    xpad_ref[PAD:PAD + H, PAD * c:PAD * c + WC] = x_ref[...]

    # Accumulator starts at the bias (saves one full-tile add).
    acc = jnp.broadcast_to(b_ref[...], (H, WC)).astype(jnp.float32)

    # 7 sublane-shifted band loads; per band, 7 static lane shifts of dx*C;
    # 49 elementwise multiply-accumulates on full 128-lane vregs.
    for dy in range(KMAX):
        band = xpad_ref[dy:dy + H, :]                    # (H, (W+6)*C)
        for dx in range(KMAX):
            tap = dy * KMAX + dx
            wt = w_ref[tap:tap + 1, :]                   # (1, W*C) row load
            acc = acc + band[:, dx * c:dx * c + WC] * wt
    o_ref[...] = acc.astype(o_ref.dtype)


def multi_scale_dwconv(x_nchw, weights, biases, channels, scales):
    """x_nchw: (B, C, H, W).  weights[i]: (ch_i, 1, k_i, k_i), biases[i]: (ch_i,)."""
    B, C, H, W = x_nchw.shape
    assert sum(channels) == C

    # ---- unify the multi-scale depthwise weights into one (49, C) tap table,
    #      then tile across W so each tap is a single lane-dense (W*C,) row.
    w_cols = []
    for w_i, k in zip(weights, scales):
        ch_i = w_i.shape[0]
        off = (KMAX - k) // 2
        w7 = jnp.zeros((ch_i, KMAX, KMAX), jnp.float32)
        w7 = w7.at[:, off:off + k, off:off + k].set(w_i[:, 0, :, :].astype(jnp.float32))
        w_cols.append(w7)
    w_all = jnp.concatenate(w_cols, axis=0)                          # (C, 7, 7)
    w_taps = jnp.transpose(w_all, (1, 2, 0)).reshape(KMAX * KMAX, C)  # (49, C)
    w_flat = jnp.tile(w_taps, (1, W))                                 # (49, W*C)
    b_flat = jnp.tile(
        jnp.concatenate(biases, axis=0).reshape(1, C).astype(jnp.float32),
        (1, W))                                                       # (1, W*C)

    # ---- lane-dense activation layout: (B, H, W*C).  (The transposes only
    #      exist because the module interface is NCHW.)
    x_flat = jnp.transpose(x_nchw, (0, 2, 3, 1)).astype(jnp.float32).reshape(B, H, W * C)

    Hp = H + 2 * PAD
    WpC = (W + 2 * PAD) * C

    kernel = functools.partial(_dwconv7_kernel, c=C)

    # TODO(synk): for large H, tile the grid as (B, H_tiles) with a 6-row halo
    # (pl.Element row indexing) so v7x's 64 MiB VMEM and 2 TensorCores stay busy.
    out_flat = pl.pallas_call(
        kernel,
        out_shape=jax.ShapeDtypeStruct((B, H, W * C), jnp.float32),
        grid_spec=pltpu.PrefetchScalarGridSpec(
            num_scalar_prefetch=0,
            grid=(B,),
            in_specs=[
                pl.BlockSpec((None, H, W * C), lambda b: (b, 0, 0)),
                pl.BlockSpec((KMAX * KMAX, W * C), lambda b: (0, 0)),
                pl.BlockSpec((1, W * C), lambda b: (0, 0)),
            ],
            out_specs=pl.BlockSpec((None, H, W * C), lambda b: (b, 0, 0)),
            scratch_shapes=[pltpu.VMEM((Hp, WpC), jnp.float32)],
        ),
        compiler_params=pltpu.CompilerParams(
            dimension_semantics=("parallel",),
            vmem_limit_bytes=32 * 1024 * 1024,
        ),
    )(x_flat, w_flat, b_flat)

    out_nhwc = out_flat.reshape(B, H, W, C)
    return jnp.transpose(out_nhwc, (0, 3, 1, 2))                      # back to NCHW


def _reference(x_nchw, weights, biases, channels, scales):
    """Pure-JAX reference replicating the PyTorch module (grouped depthwise conv)."""
    outs = []
    start = 0
    for w_i, b_i, ch_i, k in zip(weights, biases, channels, scales):
        feat = x_nchw[:, start:start + ch_i]               # (B, ch_i, H, W)
        start += ch_i
        y = lax.conv_general_dilated(
            feat.astype(jnp.float32), w_i.astype(jnp.float32),
            window_strides=(1, 1),
            padding=[(k // 2, k // 2), (k // 2, k // 2)],
            dimension_numbers=("NCHW", "OIHW", "NCHW"),
            feature_group_count=ch_i,
        ) + b_i.reshape(1, ch_i, 1, 1)
        outs.append(y)
    return jnp.concatenate(outs, axis=1)


if __name__ == "__main__":
    # Module config: dim=8, scale=(1,3,5,7) -> channel groups [2,2,2,2]
    dim = 8
    scales = (1, 3, 5, 7)
    n = len(scales)
    channels = [dim - dim // n * (n - 1)] + [dim // n] * (n - 1)

    key = jax.random.PRNGKey(0)
    keys = jax.random.split(key, 2 * n + 1)

    # Deterministic synthetic parameters (depthwise Conv2d: weight (ch,1,k,k), bias (ch,))
    weights, biases = [], []
    for i, (ch_i, k) in enumerate(zip(channels, scales)):
        weights.append(jax.random.normal(keys[2 * i], (ch_i, 1, k, k), jnp.float32) * 0.1)
        biases.append(jax.random.normal(keys[2 * i + 1], (ch_i,), jnp.float32) * 0.1)

    # Input (NCHW, like the PyTorch module)
    x = jax.random.normal(keys[-1], (2, dim, 16, 16), jnp.float32)

    out = multi_scale_dwconv(x, weights, biases, channels, scales)
    out = jax.block_until_ready(out)

    ref = jax.block_until_ready(_reference(x, weights, biases, channels, scales))
    assert out.shape == ref.shape == (2, dim, 16, 16)
    if not jnp.allclose(out, ref, atol=1e-4, rtol=1e-4):
        raise AssertionError("Pallas kernel does not match reference")

    print("KERNEL_OK")
</pallas_src>

<mosaic_0001>
module attributes {stable_mosaic.version = 11 : i64} {
  func.func @_dwconv7_kernel(%arg0: i32, %arg1: memref<1x16x128xf32, #tpu.memory_space<vmem>>, %arg2: memref<49x128xf32, #tpu.memory_space<vmem>>, %arg3: memref<1x128xf32, #tpu.memory_space<vmem>>, %arg4: memref<1x16x128xf32, #tpu.memory_space<vmem>>, %arg5: memref<22x176xf32, #tpu.memory_space<vmem>>) attributes {dimension_semantics = [#tpu.dimension_semantics<parallel>], iteration_bounds = array<i64: 2>, scalar_prefetch = 0 : i64, scratch_operands = 1 : i64, tpu.core_type = #tpu.core_type<tc>, window_params = [{transform_indices = @transform_0, window_bounds = array<i64: 1, 16, 128>}, {pipeline_mode = #tpu.pipeline_mode<synchronous>, transform_indices = @transform_1, window_bounds = array<i64: 49, 128>}, {pipeline_mode = #tpu.pipeline_mode<synchronous>, transform_indices = @transform_2, window_bounds = array<i64: 1, 128>}, {transform_indices = @transform_3, window_bounds = array<i64: 1, 16, 128>}]} {
    %cst = arith.constant 0.000000e+00 : f32
    %0 = vector.broadcast %cst : f32 to vector<22x176xf32>
    %c0 = arith.constant 0 : index
    %c0_0 = arith.constant 0 : index
    %1 = vector.load %arg5[%c0, %c0_0] : memref<22x176xf32, #tpu.memory_space<vmem>>, vector<22x176xf32>
    tpu.vector_store %arg5[%c0, %c0_0], %0 {strides = array<i32>} : memref<22x176xf32, #tpu.memory_space<vmem>>, vector<22x176xf32>,
    %c0_1 = arith.constant 0 : index
    %c0_2 = arith.constant 0 : index
    %c0_3 = arith.constant 0 : index
    %2 = vector.load %arg1[%c0_1, %c0_2, %c0_3] : memref<1x16x128xf32, #tpu.memory_space<vmem>>, vector<1x16x128xf32>
    %3 = vector.shape_cast %2 : vector<1x16x128xf32> to vector<16x128xf32>
    %c3 = arith.constant 3 : index
    %c24 = arith.constant 24 : index
    %4 = vector.load %arg5[%c3, %c24] : memref<22x176xf32, #tpu.memory_space<vmem>>, vector<16x128xf32>
    tpu.vector_store %arg5[%c3, %c24], %3 {strides = array<i32>} : memref<22x176xf32, #tpu.memory_space<vmem>>, vector<16x128xf32>,
    %c0_4 = arith.constant 0 : index
    %c0_5 = arith.constant 0 : index
    %5 = vector.load %arg3[%c0_4, %c0_5] : memref<1x128xf32, #tpu.memory_space<vmem>>, vector<1x128xf32>
    %6 = vector.shape_cast %5 : vector<1x128xf32> to vector<1x128xf32>
    %7 = vector.broadcast %6 : vector<1x128xf32> to vector<16x128xf32>
    %c0_6 = arith.constant 0 : index
    %c0_7 = arith.constant 0 : index
    %8 = vector.load %arg5[%c0_6, %c0_7] : memref<22x176xf32, #tpu.memory_space<vmem>>, vector<16x176xf32>
    %c0_8 = arith.constant 0 : index
    %c0_9 = arith.constant 0 : index
    %9 = vector.load %arg2[%c0_8, %c0_9] : memref<49x128xf32, #tpu.memory_space<vmem>>, vector<1x128xf32>
    %10 = vector.extract_strided_slice %8 {offsets = [0, 0], sizes = [16, 128], strides = [1, 1]} : vector<16x176xf32> to vector<16x128xf32>
    %11 = vector.broadcast %9 : vector<1x128xf32> to vector<16x128xf32>
    %12 = arith.mulf %10, %11 : vector<16x128xf32>
    %13 = arith.addf %7, %12 : vector<16x128xf32>
    %c1 = arith.constant 1 : index
    %c0_10 = arith.constant 0 : index
    %14 = vector.load %arg2[%c1, %c0_10] : memref<49x128xf32, #tpu.memory_space<vmem>>, vector<1x128xf32>
    %15 = vector.extract_strided_slice %8 {offsets = [0, 8], sizes = [16, 128], strides = [1, 1]} : vector<16x176xf32> to vector<16x128xf32>
    %16 = vector.broadcast %14 : vector<1x128xf32> to vector<16x128xf32>
    %17 = arith.mulf %15, %16 : vector<16x128xf32>
    %18 = arith.addf %13, %17 : vector<16x128xf32>
    %c2 = arith.constant 2 : index
    %c0_11 = arith.constant 0 : index
    %19 = vector.load %arg2[%c2, %c0_11] : memref<49x128xf32, #tpu.memory_space<vmem>>, vector<1x128xf32>
    %20 = vector.extract_strided_slice %8 {offsets = [0, 16], sizes = [16, 128], strides = [1, 1]} : vector<16x176xf32> to vector<16x128xf32>
    %21 = vector.broadcast %19 : vector<1x128xf32> to vector<16x128xf32>
    %22 = arith.mulf %20, %21 : vector<16x128xf32>
    %23 = arith.addf %18, %22 : vector<16x128xf32>
    %c3_12 = arith.constant 3 : index
    %c0_13 = arith.constant 0 : index
    %24 = vector.load %arg2[%c3_12, %c0_13] : memref<49x128xf32, #tpu.memory_space<vmem>>, vector<1x128xf32>
    %25 = vector.extract_strided_slice %8 {offsets = [0, 24], sizes = [16, 128], strides = [1, 1]} : vector<16x176xf32> to vector<16x128xf32>
    %26 = vector.broadcast %24 : vector<1x128xf32> to vector<16x128xf32>
    %27 = arith.mulf %25, %26 : vector<16x128xf32>
    %28 = arith.addf %23, %27 : vector<16x128xf32>
    %c4 = arith.constant 4 : index
    %c0_14 = arith.constant 0 : index
    %29 = vector.load %arg2[%c4, %c0_14] : memref<49x128xf32, #tpu.memory_space<vmem>>, vector<1x128xf32>
    %30 = vector.extract_strided_slice %8 {offsets = [0, 32], sizes = [16, 128], strides = [1, 1]} : vector<16x176xf32> to vector<16x128xf32>
    %31 = vector.broadcast %29 : vector<1x128xf32> to vector<16x128xf32>
    %32 = arith.mulf %30, %31 : vector<16x128xf32>
    %33 = arith.addf %28, %32 : vector<16x128xf32>
    %c5 = arith.constant 5 : index
    %c0_15 = arith.constant 0 : index
    %34 = vector.load %arg2[%c5, %c0_15] : memref<49x128xf32, #tpu.memory_space<vmem>>, vector<1x128xf32>
    %35 = vector.extract_strided_slice %8 {offsets = [0, 40], sizes = [16, 128], strides = [1, 1]} : vector<16x176xf32> to vector<16x128xf32>
    %36 = vector.broadcast %34 : vector<1x128xf32> to vector<16x128xf32>
    %37 = arith.mulf %35, %36 : vector<16x128xf32>
    %38 = arith.addf %33, %37 : vector<16x128xf32>
    %c6 = arith.constant 6 : index
    %c0_16 = arith.constant 0 : index
    %39 = vector.load %arg2[%c6, %c0_16] : memref<49x128xf32, #tpu.memory_space<vmem>>, vector<1x128xf32>
    %40 = vector.extract_strided_slice %8 {offsets = [0, 48], sizes = [16, 128], strides = [1, 1]} : vector<16x176xf32> to vector<16x128xf32>
    %41 = vector.broadcast %39 : vector<1x128xf32> to vector<16x128xf32>
    %42 = arith.mulf %40, %41 : vector<16x128xf32>
    %43 = arith.addf %38, %42 : vector<16x128xf32>
    %c1_17 = arith.constant 1 : index
    %c0_18 = arith.constant 0 : index
    %44 = vector.load %arg5[%c1_17, %c0_18] : memref<22x176xf32, #tpu.memory_space<vmem>>, vector<16x176xf32>
    %c7 = arith.constant 7 : index
    %c0_19 = arith.constant 0 : index
    %45 = vector.load %arg2[%c7, %c0_19] : memref<49x128xf32, #tpu.memory_space<vmem>>, vector<1x128xf32>
    %46 = vector.extract_strided_slice %44 {offsets = [0, 0], sizes = [16, 128], strides = [1, 1]} : vector<16x176xf32> to vector<16x128xf32>
    %47 = vector.broadcast %45 : vector<1x128xf32> to vector<16x128xf32>
    %48 = arith.mulf %46, %47 : vector<16x128xf32>
    %49 = arith.addf %43, %48 : vector<16x128xf32>
    %c8 = arith.constant 8 : index
    %c0_20 = arith.constant 0 : index
    %50 = vector.load %arg2[%c8, %c0_20] : memref<49x128xf32, #tpu.memory_space<vmem>>, vector<1x128xf32>
    %51 = vector.extract_strided_slice %44 {offsets = [0, 8], sizes = [16, 128], strides = [1, 1]} : vector<16x176xf32> to vector<16x128xf32>
    %52 = vector.broadcast %50 : vector<1x128xf32> to vector<16x128xf32>
    %53 = arith.mulf %51, %52 : vector<16x128xf32>
    %54 = arith.addf %49, %53 : vector<16x128xf32>
    %c9 = arith.constant 9 : index
    %c0_21 = arith.constant 0 : index
    %55 = vector.load %arg2[%c9, %c0_21] : memref<49x128xf32, #tpu.memory_space<vmem>>, vector<1x128xf32>
    %56 = vector.extract_strided_slice %44 {offsets = [0, 16], sizes = [16, 128], strides = [1, 1]} : vector<16x176xf32> to vector<16x128xf32>
    %57 = vector.broadcast %55 : vector<1x128xf32> to vector<16x128xf32>
    %58 = arith.mulf %56, %57 : vector<16x128xf32>
    %59 = arith.addf %54, %58 : vector<16x128xf32>
    %c10 = arith.constant 10 : index
    %c0_22 = arith.constant 0 : index
    %60 = vector.load %arg2[%c10, %c0_22] : memref<49x128xf32, #tpu.memory_space<vmem>>, vector<1x128xf32>
    %61 = vector.extract_strided_slice %44 {offsets = [0, 24], sizes = [16, 128], strides = [1, 1]} : vector<16x176xf32> to vector<16x128xf32>
    %62 = vector.broadcast %60 : vector<1x128xf32> to vector<16x128xf32>
    %63 = arith.mulf %61, %62 : vector<16x128xf32>
    %64 = arith.addf %59, %63 : vector<16x128xf32>
    %c11 = arith.constant 11 : index
    %c0_23 = arith.constant 0 : index
    %65 = vector.load %arg2[%c11, %c0_23] : memref<49x128xf32, #tpu.memory_space<vmem>>, vector<1x128xf32>
    %66 = vector.extract_strided_slice %44 {offsets = [0, 32], sizes = [16, 128], strides = [1, 1]} : vector<16x176xf32> to vector<16x128xf32>
    %67 = vector.broadcast %65 : vector<1x128xf32> to vector<16x128xf32>
    %68 = arith.mulf %66, %67 : vector<16x128xf32>
    %69 = arith.addf %64, %68 : vector<16x128xf32>
    %c12 = arith.constant 12 : index
    %c0_24 = arith.constant 0 : index
    %70 = vector.load %arg2[%c12, %c0_24] : memref<49x128xf32, #tpu.memory_space<vmem>>, vector<1x128xf32>
    %71 = vector.extract_strided_slice %44 {offsets = [0, 40], sizes = [16, 128], strides = [1, 1]} : vector<16x176xf32> to vector<16x128xf32>
    %72 = vector.broadcast %70 : vector<1x128xf32> to vector<16x128xf32>
    %73 = arith.mulf %71, %72 : vector<16x128xf32>
    %74 = arith.addf %69, %73 : vector<16x128xf32>
    %c13 = arith.constant 13 : index
    %c0_25 = arith.constant 0 : index
    %75 = vector.load %arg2[%c13, %c0_25] : memref<49x128xf32, #tpu.memory_space<vmem>>, vector<1x128xf32>
    %76 = vector.extract_strided_slice %44 {offsets = [0, 48], sizes = [16, 128], strides = [1, 1]} : vector<16x176xf32> to vector<16x128xf32>
    %77 = vector.broadcast %75 : vector<1x128xf32> to vector<16x128xf32>
    %78 = arith.mulf %76, %77 : vector<16x128xf32>
    %79 = arith.addf %74, %78 : vector<16x128xf32>
    %c2_26 = arith.constant 2 : index
    %c0_27 = arith.constant 0 : index
    %80 = vector.load %arg5[%c2_26, %c0_27] : memref<22x176xf32, #tpu.memory_space<vmem>>, vector<16x176xf32>
    %c14 = arith.constant 14 : index
    %c0_28 = arith.constant 0 : index
    %81 = vector.load %arg2[%c14, %c0_28] : memref<49x128xf32, #tpu.memory_space<vmem>>, vector<1x128xf32>
    %82 = vector.extract_strided_slice %80 {offsets = [0, 0], sizes = [16, 128], strides = [1, 1]} : vector<16x176xf32> to vector<16x128xf32>
    %83 = vector.broadcast %81 : vector<1x128xf32> to vector<16x128xf32>
    %84 = arith.mulf %82, %83 : vector<16x128xf32>
    %85 = arith.addf %79, %84 : vector<16x128xf32>
    %c15 = arith.constant 15 : index
    %c0_29 = arith.constant 0 : index
    %86 = vector.load %arg2[%c15, %c0_29] : memref<49x128xf32, #tpu.memory_space<vmem>>, vector<1x128xf32>
    %87 = vector.extract_strided_slice %80 {offsets = [0, 8], sizes = [16, 128], strides = [1, 1]} : vector<16x176xf32> to vector<16x128xf32>
    %88 = vector.broadcast %86 : vector<1x128xf32> to vector<16x128xf32>
    %89 = arith.mulf %87, %88 : vector<16x128xf32>
    %90 = arith.addf %85, %89 : vector<16x128xf32>
    %c16 = arith.constant 16 : index
    %c0_30 = arith.constant 0 : index
    %91 = vector.load %arg2[%c16, %c0_30] : memref<49x128xf32, #tpu.memory_space<vmem>>, vector<1x128xf32>
    %92 = vector.extract_strided_slice %80 {offsets = [0, 16], sizes = [16, 128], strides = [1, 1]} : vector<16x176xf32> to vector<16x128xf32>
    %93 = vector.broadcast %91 : vector<1x128xf32> to vector<16x128xf32>
    %94 = arith.mulf %92, %93 : vector<16x128xf32>
    %95 = arith.addf %90, %94 : vector<16x128xf32>
    %c17 = arith.constant 17 : index
    %c0_31 = arith.constant 0 : index
    %96 = vector.load %arg2[%c17, %c0_31] : memref<49x128xf32, #tpu.memory_space<vmem>>, vector<1x128xf32>
    %97 = vector.extract_strided_slice %80 {offsets = [0, 24], sizes = [16, 128], strides = [1, 1]} : vector<16x176xf32> to vector<16x128xf32>
    %98 = vector.broadcast %96 : vector<1x128xf32> to vector<16x128xf32>
    %99 = arith.mulf %97, %98 : vector<16x128xf32>
    %100 = arith.addf %95, %99 : vector<16x128xf32>
    %c18 = arith.constant 18 : index
    %c0_32 = arith.constant 0 : index
    %101 = vector.load %arg2[%c18, %c0_32] : memref<49x128xf32, #tpu.memory_space<vmem>>, vector<1x128xf32>
    %102 = vector.extract_strided_slice %80 {offsets = [0, 32], sizes = [16, 128], strides = [1, 1]} : vector<16x176xf32> to vector<16x128xf32>
    %103 = vector.broadcast %101 : vector<1x128xf32> to vector<16x128xf32>
    %104 = arith.mulf %102, %103 : vector<16x128xf32>
    %105 = arith.addf %100, %104 : vector<16x128xf32>
    %c19 = arith.constant 19 : index
    %c0_33 = arith.constant 0 : index
    %106 = vector.load %arg2[%c19, %c0_33] : memref<49x128xf32, #tpu.memory_space<vmem>>, vector<1x128xf32>
    %107 = vector.extract_strided_slice %80 {offsets = [0, 40], sizes = [16, 128], strides = [1, 1]} : vector<16x176xf32> to vector<16x128xf32>
    %108 = vector.broadcast %106 : vector<1x128xf32> to vector<16x128xf32>
    %109 = arith.mulf %107, %108 : vector<16x128xf32>
    %110 = arith.addf %105, %109 : vector<16x128xf32>
    %c20 = arith.constant 20 : index
    %c0_34 = arith.constant 0 : index
    %111 = vector.load %arg2[%c20, %c0_34] : memref<49x128xf32, #tpu.memory_space<vmem>>, vector<1x128xf32>
    %112 = vector.extract_strided_slice %80 {offsets = [0, 48], sizes = [16, 128], strides = [1, 1]} : vector<16x176xf32> to vector<16x128xf32>
    %113 = vector.broadcast %111 : vector<1x128xf32> to vector<16x128xf32>
    %114 = arith.mulf %112, %113 : vector<16x128xf32>
    %115 = arith.addf %110, %114 : vector<16x128xf32>
    %c3_35 = arith.constant 3 : index
    %c0_36 = arith.constant 0 : index
    %116 = vector.load %arg5[%c3_35, %c0_36] : memref<22x176xf32, #tpu.memory_space<vmem>>, vector<16x176xf32>
    %c21 = arith.constant 21 : index
    %c0_37 = arith.constant 0 : index
    %117 = vector.load %arg2[%c21, %c0_37] : memref<49x128xf32, #tpu.memory_space<vmem>>, vector<1x128xf32>
    %118 = vector.extract_strided_slice %116 {offsets = [0, 0], sizes = [16, 128], strides = [1, 1]} : vector<16x176xf32> to vector<16x128xf32>
    %119 = vector.broadcast %117 : vector<1x128xf32> to vector<16x128xf32>
    %120 = arith.mulf %118, %119 : vector<16x128xf32>
    %121 = arith.addf %115, %120 : vector<16x128xf32>
    %c22 = arith.constant 22 : index
    %c0_38 = arith.constant 0 : index
    %122 = vector.load %arg2[%c22, %c0_38] : memref<49x128xf32, #tpu.memory_space<vmem>>, vector<1x128xf32>
    %123 = vector.extract_strided_slice %116 {offsets = [0, 8], sizes = [16, 128], strides = [1, 1]} : vector<16x176xf32> to vector<16x128xf32>
    %124 = vector.broadcast %122 : vector<1x128xf32> to vector<16x128xf32>
    %125 = arith.mulf %123, %124 : vector<16x128xf32>
    %126 = arith.addf %121, %125 : vector<16x128xf32>
    %c23 = arith.constant 23 : index
    %c0_39 = arith.constant 0 : index
    %127 = vector.load %arg2[%c23, %c0_39] : memref<49x128xf32, #tpu.memory_space<vmem>>, vector<1x128xf32>
    %128 = vector.extract_strided_slice %116 {offsets = [0, 16], sizes = [16, 128], strides = [1, 1]} : vector<16x176xf32> to vector<16x128xf32>
    %129 = vector.broadcast %127 : vector<1x128xf32> to vector<16x128xf32>
    %130 = arith.mulf %128, %129 : vector<16x128xf32>
    %131 = arith.addf %126, %130 : vector<16x128xf32>
    %c24_40 = arith.constant 24 : index
    %c0_41 = arith.constant 0 : index
    %132 = vector.load %arg2[%c24_40, %c0_41] : memref<49x128xf32, #tpu.memory_space<vmem>>, vector<1x128xf32>
    %133 = vector.extract_strided_slice %116 {offsets = [0, 24], sizes = [16, 128], strides = [1, 1]} : vector<16x176xf32> to vector<16x128xf32>
    %134 = vector.broadcast %132 : vector<1x128xf32> to vector<16x128xf32>
    %135 = arith.mulf %133, %134 : vector<16x128xf32>
    %136 = arith.addf %131, %135 : vector<16x128xf32>
    %c25 = arith.constant 25 : index
    %c0_42 = arith.constant 0 : index
    %137 = vector.load %arg2[%c25, %c0_42] : memref<49x128xf32, #tpu.memory_space<vmem>>, vector<1x128xf32>
    %138 = vector.extract_strided_slice %116 {offsets = [0, 32], sizes = [16, 128], strides = [1, 1]} : vector<16x176xf32> to vector<16x128xf32>
    %139 = vector.broadcast %137 : vector<1x128xf32> to vector<16x128xf32>
    %140 = arith.mulf %138, %139 : vector<16x128xf32>
    %141 = arith.addf %136, %140 : vector<16x128xf32>
    %c26 = arith.constant 26 : index
    %c0_43 = arith.constant 0 : index
    %142 = vector.load %arg2[%c26, %c0_43] : memref<49x128xf32, #tpu.memory_space<vmem>>, vector<1x128xf32>
    %143 = vector.extract_strided_slice %116 {offsets = [0, 40], sizes = [16, 128], strides = [1, 1]} : vector<16x176xf32> to vector<16x128xf32>
    %144 = vector.broadcast %142 : vector<1x128xf32> to vector<16x128xf32>
    %145 = arith.mulf %143, %144 : vector<16x128xf32>
    %146 = arith.addf %141, %145 : vector<16x128xf32>
    %c27 = arith.constant 27 : index
    %c0_44 = arith.constant 0 : index
    %147 = vector.load %arg2[%c27, %c0_44] : memref<49x128xf32, #tpu.memory_space<vmem>>, vector<1x128xf32>
    %148 = vector.extract_strided_slice %116 {offsets = [0, 48], sizes = [16, 128], strides = [1, 1]} : vector<16x176xf32> to vector<16x128xf32>
    %149 = vector.broadcast %147 : vector<1x128xf32> to vector<16x128xf32>
    %150 = arith.mulf %148, %149 : vector<16x128xf32>
    %151 = arith.addf %146, %150 : vector<16x128xf32>
    %c4_45 = arith.constant 4 : index
    %c0_46 = arith.constant 0 : index
    %152 = vector.load %arg5[%c4_45, %c0_46] : memref<22x176xf32, #tpu.memory_space<vmem>>, vector<16x176xf32>
    %c28 = arith.constant 28 : index
    %c0_47 = arith.constant 0 : index
    %153 = vector.load %arg2[%c28, %c0_47] : memref<49x128xf32, #tpu.memory_space<vmem>>, vector<1x128xf32>
    %154 = vector.extract_strided_slice %152 {offsets = [0, 0], sizes = [16, 128], strides = [1, 1]} : vector<16x176xf32> to vector<16x128xf32>
    %155 = vector.broadcast %153 : vector<1x128xf32> to vector<16x128xf32>
    %156 = arith.mulf %154, %155 : vector<16x128xf32>
    %157 = arith.addf %151, %156 : vector<16x128xf32>
    %c29 = arith.constant 29 : index
    %c0_48 = arith.constant 0 : index
    %158 = vector.load %arg2[%c29, %c0_48] : memref<49x128xf32, #tpu.memory_space<vmem>>, vector<1x128xf32>
    %159 = vector.extract_strided_slice %152 {offsets = [0, 8], sizes = [16, 128], strides = [1, 1]} : vector<16x176xf32> to vector<16x128xf32>
    %160 = vector.broadcast %158 : vector<1x128xf32> to vector<16x128xf32>
    %161 = arith.mulf %159, %160 : vector<16x128xf32>
    %162 = arith.addf %157, %161 : vector<16x128xf32>
    %c30 = arith.constant 30 : index
    %c0_49 = arith.constant 0 : index
    %163 = vector.load %arg2[%c30, %c0_49] : memref<49x128xf32, #tpu.memory_space<vmem>>, vector<1x128xf32>
    %164 = vector.extract_strided_slice %152 {offsets = [0, 16], sizes = [16, 128], strides = [1, 1]} : vector<16x176xf32> to vector<16x128xf32>
    %165 = vector.broadcast %163 : vector<1x128xf32> to vector<16x128xf32>
    %166 = arith.mulf %164, %165 : vector<16x128xf32>
    %167 = arith.addf %162, %166 : vector<16x128xf32>
    %c31 = arith.constant 31 : index
    %c0_50 = arith.constant 0 : index
    %168 = vector.load %arg2[%c31, %c0_50] : memref<49x128xf32, #tpu.memory_space<vmem>>, vector<1x128xf32>
    %169 = vector.extract_strided_slice %152 {offsets = [0, 24], sizes = [16, 128], strides = [1, 1]} : vector<16x176xf32> to vector<16x128xf32>
    %170 = vector.broadcast %168 : vector<1x128xf32> to vector<16x128xf32>
    %171 = arith.mulf %169, %170 : vector<16x128xf32>
    %172 = arith.addf %167, %171 : vector<16x128xf32>
    %c32 = arith.constant 32 : index
    %c0_51 = arith.constant 0 : index
    %173 = vector.load %arg2[%c32, %c0_51] : memref<49x128xf32, #tpu.memory_space<vmem>>, vector<1x128xf32>
    %174 = vector.extract_strided_slice %152 {offsets = [0, 32], sizes = [16, 128], strides = [1, 1]} : vector<16x176xf32> to vector<16x128xf32>
    %175 = vector.broadcast %173 : vector<1x128xf32> to vector<16x128xf32>
    %176 = arith.mulf %174, %175 : vector<16x128xf32>
    %177 = arith.addf %172, %176 : vector<16x128xf32>
    %c33 = arith.constant 33 : index
    %c0_52 = arith.constant 0 : index
    %178 = vector.load %arg2[%c33, %c0_52] : memref<49x128xf32, #tpu.memory_space<vmem>>, vector<1x128xf32>
    %179 = vector.extract_strided_slice %152 {offsets = [0, 40], sizes = [16, 128], strides = [1, 1]} : vector<16x176xf32> to vector<16x128xf32>
    %180 = vector.broadcast %178 : vector<1x128xf32> to vector<16x128xf32>
    %181 = arith.mulf %179, %180 : vector<16x128xf32>
    %182 = arith.addf %177, %181 : vector<16x128xf32>
    %c34 = arith.constant 34 : index
    %c0_53 = arith.constant 0 : index
    %183 = vector.load %arg2[%c34, %c0_53] : memref<49x128xf32, #tpu.memory_space<vmem>>, vector<1x128xf32>
    %184 = vector.extract_strided_slice %152 {offsets = [0, 48], sizes = [16, 128], strides = [1, 1]} : vector<16x176xf32> to vector<16x128xf32>
    %185 = vector.broadcast %183 : vector<1x128xf32> to vector<16x128xf32>
    %186 = arith.mulf %184, %185 : vector<16x128xf32>
    %187 = arith.addf %182, %186 : vector<16x128xf32>
    %c5_54 = arith.constant 5 : index
    %c0_55 = arith.constant 0 : index
    %188 = vector.load %arg5[%c5_54, %c0_55] : memref<22x176xf32, #tpu.memory_space<vmem>>, vector<16x176xf32>
    %c35 = arith.constant 35 : index
    %c0_56 = arith.constant 0 : index
    %189 = vector.load %arg2[%c35, %c0_56] : memref<49x128xf32, #tpu.memory_space<vmem>>, vector<1x128xf32>
    %190 = vector.extract_strided_slice %188 {offsets = [0, 0], sizes = [16, 128], strides = [1, 1]} : vector<16x176xf32> to vector<16x128xf32>
    %191 = vector.broadcast %189 : vector<1x128xf32> to vector<16x128xf32>
    %192 = arith.mulf %190, %191 : vector<16x128xf32>
    %193 = arith.addf %187, %192 : vector<16x128xf32>
    %c36 = arith.constant 36 : index
    %c0_57 = arith.constant 0 : index
    %194 = vector.load %arg2[%c36, %c0_57] : memref<49x128xf32, #tpu.memory_space<vmem>>, vector<1x128xf32>
    %195 = vector.extract_strided_slice %188 {offsets = [0, 8], sizes = [16, 128], strides = [1, 1]} : vector<16x176xf32> to vector<16x128xf32>
    %196 = vector.broadcast %194 : vector<1x128xf32> to vector<16x128xf32>
    %197 = arith.mulf %195, %196 : vector<16x128xf32>
    %198 = arith.addf %193, %197 : vector<16x128xf32>
    %c37 = arith.constant 37 : index
    %c0_58 = arith.constant 0 : index
    %199 = vector.load %arg2[%c37, %c0_58] : memref<49x128xf32, #tpu.memory_space<vmem>>, vector<1x128xf32>
    %200 = vector.extract_strided_slice %188 {offsets = [0, 16], sizes = [16, 128], strides = [1, 1]} : vector<16x176xf32> to vector<16x128xf32>
    %201 = vector.broadcast %199 : vector<1x128xf32> to vector<16x128xf32>
    %202 = arith.mulf %200, %201 : vector<16x128xf32>
    %203 = arith.addf %198, %202 : vector<16x128xf32>
    %c38 = arith.constant 38 : index
    %c0_59 = arith.constant 0 : index
    %204 = vector.load %arg2[%c38, %c0_59] : memref<49x128xf32, #tpu.memory_space<vmem>>, vector<1x128xf32>
    %205 = vector.extract_strided_slice %188 {offsets = [0, 24], sizes = [16, 128], strides = [1, 1]} : vector<16x176xf32> to vector<16x128xf32>
    %206 = vector.broadcast %204 : vector<1x128xf32> to vector<16x128xf32>
    %207 = arith.mulf %205, %206 : vector<16x128xf32>
    %208 = arith.addf %203, %207 : vector<16x128xf32>
    %c39 = arith.constant 39 : index
    %c0_60 = arith.constant 0 : index
    %209 = vector.load %arg2[%c39, %c0_60] : memref<49x128xf32, #tpu.memory_space<vmem>>, vector<1x128xf32>
    %210 = vector.extract_strided_slice %188 {offsets = [0, 32], sizes = [16, 128], strides = [1, 1]} : vector<16x176xf32> to vector<16x128xf32>
    %211 = vector.broadcast %209 : vector<1x128xf32> to vector<16x128xf32>
    %212 = arith.mulf %210, %211 : vector<16x128xf32>
    %213 = arith.addf %208, %212 : vector<16x128xf32>
    %c40 = arith.constant 40 : index
    %c0_61 = arith.constant 0 : index
    %214 = vector.load %arg2[%c40, %c0_61] : memref<49x128xf32, #tpu.memory_space<vmem>>, vector<1x128xf32>
    %215 = vector.extract_strided_slice %188 {offsets = [0, 40], sizes = [16, 128], strides = [1, 1]} : vector<16x176xf32> to vector<16x128xf32>
    %216 = vector.broadcast %214 : vector<1x128xf32> to vector<16x128xf32>
    %217 = arith.mulf %215, %216 : vector<16x128xf32>
    %218 = arith.addf %213, %217 : vector<16x128xf32>
    %c41 = arith.constant 41 : index
    %c0_62 = arith.constant 0 : index
    %219 = vector.load %arg2[%c41, %c0_62] : memref<49x128xf32, #tpu.memory_space<vmem>>, vector<1x128xf32>
    %220 = vector.extract_strided_slice %188 {offsets = [0, 48], sizes = [16, 128], strides = [1, 1]} : vector<16x176xf32> to vector<16x128xf32>
    %221 = vector.broadcast %219 : vector<1x128xf32> to vector<16x128xf32>
    %222 = arith.mulf %220, %221 : vector<16x128xf32>
    %223 = arith.addf %218, %222 : vector<16x128xf32>
    %c6_63 = arith.constant 6 : index
    %c0_64 = arith.constant 0 : index
    %224 = vector.load %arg5[%c6_63, %c0_64] : memref<22x176xf32, #tpu.memory_space<vmem>>, vector<16x176xf32>
    %c42 = arith.constant 42 : index
    %c0_65 = arith.constant 0 : index
    %225 = vector.load %arg2[%c42, %c0_65] : memref<49x128xf32, #tpu.memory_space<vmem>>, vector<1x128xf32>
    %226 = vector.extract_strided_slice %224 {offsets = [0, 0], sizes = [16, 128], strides = [1, 1]} : vector<16x176xf32> to vector<16x128xf32>
    %227 = vector.broadcast %225 : vector<1x128xf32> to vector<16x128xf32>
    %228 = arith.mulf %226, %227 : vector<16x128xf32>
    %229 = arith.addf %223, %228 : vector<16x128xf32>
    %c43 = arith.constant 43 : index
    %c0_66 = arith.constant 0 : index
    %230 = vector.load %arg2[%c43, %c0_66] : memref<49x128xf32, #tpu.memory_space<vmem>>, vector<1x128xf32>
    %231 = vector.extract_strided_slice %224 {offsets = [0, 8], sizes = [16, 128], strides = [1, 1]} : vector<16x176xf32> to vector<16x128xf32>
    %232 = vector.broadcast %230 : vector<1x128xf32> to vector<16x128xf32>
    %233 = arith.mulf %231, %232 : vector<16x128xf32>
    %234 = arith.addf %229, %233 : vector<16x128xf32>
    %c44 = arith.constant 44 : index
    %c0_67 = arith.constant 0 : index
    %235 = vector.load %arg2[%c44, %c0_67] : memref<49x128xf32, #tpu.memory_space<vmem>>, vector<1x128xf32>
    %236 = vector.extract_strided_slice %224 {offsets = [0, 16], sizes = [16, 128], strides = [1, 1]} : vector<16x176xf32> to vector<16x128xf32>
    %237 = vector.broadcast %235 : vector<1x128xf32> to vector<16x128xf32>
    %238 = arith.mulf %236, %237 : vector<16x128xf32>
    %239 = arith.addf %234, %238 : vector<16x128xf32>
    %c45 = arith.constant 45 : index
    %c0_68 = arith.constant 0 : index
    %240 = vector.load %arg2[%c45, %c0_68] : memref<49x128xf32, #tpu.memory_space<vmem>>, vector<1x128xf32>
    %241 = vector.extract_strided_slice %224 {offsets = [0, 24], sizes = [16, 128], strides = [1, 1]} : vector<16x176xf32> to vector<16x128xf32>
    %242 = vector.broadcast %240 : vector<1x128xf32> to vector<16x128xf32>
    %243 = arith.mulf %241, %242 : vector<16x128xf32>
    %244 = arith.addf %239, %243 : vector<16x128xf32>
    %c46 = arith.constant 46 : index
    %c0_69 = arith.constant 0 : index
    %245 = vector.load %arg2[%c46, %c0_69] : memref<49x128xf32, #tpu.memory_space<vmem>>, vector<1x128xf32>
    %246 = vector.extract_strided_slice %224 {offsets = [0, 32], sizes = [16, 128], strides = [1, 1]} : vector<16x176xf32> to vector<16x128xf32>
    %247 = vector.broadcast %245 : vector<1x128xf32> to vector<16x128xf32>
    %248 = arith.mulf %246, %247 : vector<16x128xf32>
    %249 = arith.addf %244, %248 : vector<16x128xf32>
    %c47 = arith.constant 47 : index
    %c0_70 = arith.constant 0 : index
    %250 = vector.load %arg2[%c47, %c0_70] : memref<49x128xf32, #tpu.memory_space<vmem>>, vector<1x128xf32>
    %251 = vector.extract_strided_slice %224 {offsets = [0, 40], sizes = [16, 128], strides = [1, 1]} : vector<16x176xf32> to vector<16x128xf32>
    %252 = vector.broadcast %250 : vector<1x128xf32> to vector<16x128xf32>
    %253 = arith.mulf %251, %252 : vector<16x128xf32>
    %254 = arith.addf %249, %253 : vector<16x128xf32>
    %c48 = arith.constant 48 : index
    %c0_71 = arith.constant 0 : index
    %255 = vector.load %arg2[%c48, %c0_71] : memref<49x128xf32, #tpu.memory_space<vmem>>, vector<1x128xf32>
    %256 = vector.extract_strided_slice %224 {offsets = [0, 48], sizes = [16, 128], strides = [1, 1]} : vector<16x176xf32> to vector<16x128xf32>
    %257 = vector.broadcast %255 : vector<1x128xf32> to vector<16x128xf32>
    %258 = arith.mulf %256, %257 : vector<16x128xf32>
    %259 = arith.addf %254, %258 : vector<16x128xf32>
    %c0_72 = arith.constant 0 : index
    %c0_73 = arith.constant 0 : index
    %c0_74 = arith.constant 0 : index
    %260 = vector.load %arg4[%c0_72, %c0_73, %c0_74] : memref<1x16x128xf32, #tpu.memory_space<vmem>>, vector<1x16x128xf32>
    %261 = vector.shape_cast %260 : vector<1x16x128xf32> to vector<16x128xf32>
    %262 = vector.shape_cast %259 : vector<16x128xf32> to vector<1x16x128xf32>
    tpu.vector_store %arg4[%c0_72, %c0_73, %c0_74], %262 {strides = array<i32>} : memref<1x16x128xf32, #tpu.memory_space<vmem>>, vector<1x16x128xf32>,
    return
  }
  func.func @transform_0(%arg0: i32) -> (i32, i32, i32) {
    %c0_i32 = arith.constant 0 : i32
    %c0_i32_0 = arith.constant 0 : i32
    %c0_i32_1 = arith.constant 0 : i32
    return %arg0, %c0_i32, %c0_i32_0 : i32, i32, i32
  }
  func.func @transform_1(%arg0: i32) -> (i32, i32) {
    %c0_i32 = arith.constant 0 : i32
    %c0_i32_0 = arith.constant 0 : i32
    %c0_i32_1 = arith.constant 0 : i32
    return %c0_i32, %c0_i32_0 : i32, i32
  }
  func.func @transform_2(%arg0: i32) -> (i32, i32) {
    %c0_i32 = arith.constant 0 : i32
    %c0_i32_0 = arith.constant 0 : i32
    %c0_i32_1 = arith.constant 0 : i32
    return %c0_i32, %c0_i32_0 : i32, i32
  }
  func.func @transform_3(%arg0: i32) -> (i32, i32, i32) {
    %c0_i32 = arith.constant 0 : i32
    %c0_i32_0 = arith.constant 0 : i32
    %c0_i32_1 = arith.constant 0 : i32
    return %arg0, %c0_i32, %c0_i32_0 : i32, i32, i32
  }
}

</mosaic_0001>

<bundles_post_ra>
// kernel: tpu_custom_call.1
= control target key start
LH: loop header
LB: loop body
LE: loop exit
PB: predicated region body
PF: predicated region fallthrough
CT: control target
= control target key end

     0   :  { %8 = vsyncpa [#allocation4], 0  ;;  %s3927_s0 = inlined_call_operand.hbm [shape: f32[2,16,128], index: 0, kind: input, shape index: {}]   ;;  %s3928_s1 = inlined_call_operand.hbm [shape: f32[49,128], index: 1, kind: input, shape index: {}]   ;;  %s3929_s2 = inlined_call_operand.vmem [shape: f32[1,128], index: 2, kind: input, shape index: {}]   ;;  %s3930_s3 = inlined_call_operand.hbm [shape: f32[2,16,128], index: 3, kind: output, shape index: {}]  }
   0x1   :  { %10 = vsyncpa [#allocation4 + $0x1], 0 }
   0x2   :  { %11 = vsyncpa [#allocation7], 0 }
   0x3   :  { %12 = vsyncpa [#allocation5], 0 }
   0x4   :  { %14 = vsyncpa [#allocation5 + $0x1], 0  ;;  %s2629_s12 = smov 0   ;;  %s2631_s13 = smov 0  }
   0x5   :  { %s2633_s14 = smov 0   ;;  %s2635_s15 = smov 0  }
   0x6 LB: > { %s2650_s16 = sadd.s32 4294967295, %s2588_s15   ;;  %s2321_s17 = sadd.s32 4294967294, %s2588_s15   ;;  %s2588_s15 = sphi %s2635_s15, %s4034_s15   ;;  %s2584_s14 = sphi %s2633_s14, %s4033_s14   ;;  %s2580_s13 = sphi %s2631_s13, %s4032_s13   ;;  %s2576_s12 = sphi %s2629_s12, %s4031_s12  }
   0x7   : > { %p40_p0 = scmp.ne.s32.totalorder %s2580_s13, %s2576_s12  ;;  %p3931_p1 = scmp.eq.s32.totalorder %s2650_s16, 0 }
   0x8   : > { %p112_p3 = scmp.eq.s32.totalorder %s2321_s17, 1  ;;  %p2322_p5 = scmp.ge.s32.totalorder %s2588_s15, 1 }
   0x9   : > { %p2659_p4 = por %p3931_p1, %p40_p0  ;;  %p119_p7 = scmp.lt.s32.totalorder %s2588_s15, 3 }
   0xa   : > { %p2664_p6 = por %p112_p3, %p40_p0  ;;  %s2590_s21 = smov [#allocation6]  }
   0xb   : > { %s3939_s18 = scalar_select %p2659_p4, 1, 0 }
   0xc   : > { %s3940_s19 = scalar_select %p2664_p6, 1, 0 }
   0xd   : > { %p2669_p8 = pnand %p2322_p5, %p119_p7  ;;  %s131_s22 = sshll.u32 %s2590_s21, 4  ;;  %s132_s22 = int_to_ptr.vmem [resolvable:$true] %s131_s22 }
   0xe   : > { %s2683_s24 = sadd.s32 1, %s2588_s15   ;;  %s27_s25 = sadd.s32 1, %s2584_s14 }
   0xf   : > { %s3941_s20 = scalar_select %p2669_p8, 1, 0 }
  0x10   : > { %p2397_p9 = pneg %p2669_p8  ;;  %s24_s26 = ssub.s32 %s2588_s15, %s2683_s24 }
  0x11   : > { %s2477_s27 = scalar_lea.vmem %s132_s22, 896  ;;  %p2485_p5 = scmp.lt.s32.totalorder %s132_s22, %s132_s22 }
  0x12   : > { %p2678_p11 = pnand %p2397_p9, %p3931_p1  ;;  %p2478_p13 = scmp.ne.s32.totalorder %s132_s22, %s2477_s27 }
  0x13   : > { %p2486_p7 = scmp.lt.s32.totalorder %s2477_s27, %s2477_s27 }
  0x14   : > { %p2468_p12 = pneg %p2678_p11 }
  0x15   : > { %p2487_p10 = por %p2486_p7, %p2485_p5 }
  0x16   : > { %p2480_p0 = pnand %p2478_p13, %p2468_p12 }
  0x18   : > { %p2481_p3 = pneg %p2480_p0 }
  0x1a   : > { %p2488_p2 = pnand %p2487_p10, %p2481_p3 }
  0x1c   : > { %2491 = shalt.err (!%p2488_p2)
}
  0x1d   : > { %s2591_s28 = smov 128   ;;  %s2592_s29 = smov 8  }
  0x1e   : > { %2400 = dma.hbm_to_vmem [thread:$0]  (!%p2678_p11), %s3928_s1, 896, %s132_s22, [#allocation7], %s2591_s28, %s2591_s28, %s2592_s29  }
  0x1f   : > { %p25_p2 = scmp.eq.s32.totalorder %s24_s26, 0  ;;  %p34_p9 = scmp.ne.s32.totalorder %s2584_s14, %s2580_s13 }
  0x20   : > { %p35_p10 = scmp.eq.s32.totalorder %s2588_s15, 0  ;;  %p2410_p12 = scmp.lt.s32.totalorder %s2588_s15, 2 }
  0x21   : > { %s2703_s5 = scalar_select %p25_p2, %s2584_s14, %s27_s25  }
  0x22   : > { %p36_p13 = por %p35_p10, %p34_p9  ;;  %p3943_p0 = scmp.eq.s32.totalorder %s2650_s16, 1 }
  0x23   : > { %s148_s7 = sand.u32 1, %s2584_s14   ;;  %s2387_s8 = sshll.u32 %s2588_s15, 8 }
  0x24   : > { %p2707_p3 = por %p3943_p0, %p34_p9  ;;  %s2325_s9 = sshll.u32 %s148_s7, 4 }
  0x25   : > { %s2716_s17 = scalar_lea.hbm %s3927_s0, %s2387_s8  ;;  %s152_s21 = scalar_lea.vmem [#allocation3], %s2325_s9 }
  0x26   : > { %s3944_s6 = scalar_select %p2707_p3, 1, 0 }
  0x27   : > { %s159_s22 = sshll.u32 %s152_s21, 4  ;;  %p2718_p11 = pnand %p2410_p12, %p36_p13  ;;  %s2722_s22 = int_to_ptr.vmem [resolvable:$true] %s159_s22 }
  0x28   : > { %s2724_s25 = scalar_lea.sflag [#allocation4], %s148_s7  ;;  %s2492_s26 = scalar_lea.hbm %s2716_s17, 256 }
  0x29   : > { %p2493_p5 = scmp.ne.s32.totalorder %s2716_s17, %s2492_s26  ;;  %p2494_p7 = pneg %p2718_p11 }
  0x2a   : > { %s2497_s4 = scalar_lea.hbm %s3927_s0, 512  ;;  %p2498_p10 = scmp.lt.s32.totalorder %s2716_s17, %s3927_s0 }
  0x2b   : > { %p2495_p2 = pnand %p2494_p7, %p2493_p5  ;;  %p2499_p12 = scmp.lt.s32.totalorder %s2497_s4, %s2492_s26 }
  0x2d   : > { %p2496_p9 = pneg %p2495_p2  ;;  %p2500_p13 = por %p2499_p12, %p2498_p10 }
  0x2f   : > { %p2501_p0 = pnand %p2500_p13, %p2496_p9 }
  0x31   : > { %2504 = shalt.err (!%p2501_p0)
}
  0x32   : > { %s2505_s7 = scalar_lea.vmem %s2722_s22, 256  ;;  %s2593_s10 = smov [#allocation3]  }
  0x33   : > { %p2506_p1 = scmp.ne.s32.totalorder %s2722_s22, %s2505_s7  ;;  %s2510_s11 = sshll.u32 %s2593_s10, 4  ;;  %s2511_s11 = int_to_ptr.vmem [resolvable:$false] %s2510_s11 }
  0x34   : > { %s2512_s21 = scalar_lea.vmem %s2511_s11, 512  ;;  %p2513_p2 = scmp.lt.s32.totalorder %s2722_s22, %s2511_s11 }
  0x35   : > { %p2508_p6 = pnand %p2506_p1, %p2494_p7  ;;  %p2514_p3 = scmp.lt.s32.totalorder %s2512_s21, %s2505_s7 }
  0x37   : > { %p2509_p5 = pneg %p2508_p6  ;;  %p2515_p4 = por %p2514_p3, %p2513_p2 }
  0x39   : > { %p2516_p8 = pnand %p2515_p4, %p2509_p5 }
  0x3b   : > { %2519 = shalt.err (!%p2516_p8)
}
  0x3c   : > { %2404 = dma.hbm_to_vmem [thread:$0]  (!%p2718_p11), %s2716_s17, 256, %s2722_s22, %s2724_s25, %s2591_s28, %s2591_s28, %s2592_s29  }
  0x3d   : > { %p3946_p1 = scmp.ne.s32.totalorder %s3941_s20, 0 }
  0x3f   : > { %171 = sbr.rel (%p3946_p1) target bundleno = 2338 (0x922), region = 32 }
  0x44   : > { %s2751_s26 = sand.u32 1, %s2580_s13   ;;  %p3947_p4 = scmp.ne.s32.totalorder %s3939_s18, 0 }
  0x45   : > { %s2329_s27 = sshll.u32 %s2751_s26, 4  ;;  %s174_s30 = scalar_lea.sflag [#allocation4], %s2751_s26 }
  0x46   : > { %s177_s23 = scalar_lea.vmem [#allocation3], %s2329_s27 }
  0x47   : > { %2563 = dma.done.wait (%p3947_p4), %s174_s30, 256  }
  0x48   : > { %2565 = vsyncadd (%p3947_p4), %s174_s30, 4294967040  ;;  %p3948_p6 = scmp.eq.s32.totalorder %s2650_s16, 0 }
  0x4a   : > { %2567 = dma.done.wait (%p3948_p6), [#allocation7], 896   ;;  %p3949_p8 = pmov %p3948_p6 }
  0x4b   : > { %vm205_vm0 = vcmask 392192   ;;  %v2594_v0 = vmov 0.0   ;;  %vm210_vm1 = vcmask 390144   ;;  %v2335_v1 = vld [vmem:[#allocation6 + $0x2] ss:$0 sm:$0xff]  ;;  %s2595_s20 = smov 16  }
  0x4c   : > { %2569 = vsyncadd (%p3949_p8), [#allocation7], 4294966400  ;;  %204 = vst [vmem:[#allocation2] sm:$0xff] %v2594_v0  ;;  %v2334_v2 = vld [vmem:[#allocation6 + $0x1] ss:$0 sm:$0xff]  ;;  %299 = vrot.lane.b32.xlu0 %v2335_v1, %s2595_s20  ;;  %s2596_s18 = smov 8  }
  0x4d   : > { %207 = vst [vmem:[#allocation2 + $0x10] sm:$0xff] %v2594_v0  ;;  %209 = vst [vmem:[#allocation2 + $0x20] sm:$0x3f] %v2594_v0  ;;  %267 = vrot.lane.b32.xlu1 %v2334_v2, %s2596_s18  ;;  %v212_v3 = vld [vmem:[%s177_s23] sm:$0xff]  ;;  %v213_v4 = vld [vmem:[%s177_s23 + $0x8] sm:$0xff]  ;;  %vm216_vm2 = vcmask 1042432  }
  0x4e   : > { %206 = vst.msk [vmem:[#allocation2 + $0x8] sm:$0xff] %vm205_vm0, %v2594_v0  ;;  %208 = vst.msk [vmem:[#allocation2 + $0x18] sm:$0xff] %vm205_vm0, %v2594_v0  ;;  %v2336_v5 = vld [vmem:[#allocation6 + $0x3] ss:$0 sm:$0xff]  ;;  %v217_v6 = vrot.slane %v212_v3, 5  ;;  %v218_v7 = vrot.slane %v213_v4, 5 }
  0x4f   : > { %211 = vst.msk [vmem:[#allocation2 + $0x28] sm:$0x3f] %vm210_vm1, %v2594_v0  ;;  %s2597_s28 = smov 24   ;;  %v2338_v9 = vld [vmem:[#allocation6 + $0x5] ss:$0 sm:$0xff]  ;;  %s2598_s29 = smov 40  }
  0x50   : > { %220 = vrot.lane.b32.xlu0 %v217_v6, %s2597_s28  ;;  %v219_v8 = vsel %vm216_vm2, %v217_v6, %v218_v7  ;;  %v2337_v10 = vld [vmem:[#allocation6 + $0x4] ss:$0 sm:$0xff]  ;;  %s2599_s17 = smov 32   ;;  %v2341_v11 = vld [vmem:[#allocation6 + $0x8] ss:$0 sm:$0xff]  ;;  %s2600_s22 = smov 48  }
  0x51   : > { %331 = vrot.lane.b32.xlu1 %v2336_v5, %s2597_s28  ;;  %v2339_v12 = vld [vmem:[#allocation6 + $0x6] ss:$0 sm:$0xff]  ;;  %v2343_v13 = vld [vmem:[#allocation6 + $0xa] ss:$0 sm:$0xff]  ;;  %v2342_v14 = vld [vmem:[#allocation6 + $0x9] ss:$0 sm:$0xff] }
  0x52   : > { %v2345_v15 = vld [vmem:[#allocation6 + $0xc] ss:$0 sm:$0xff]  ;;  %v2344_v16 = vld [vmem:[#allocation6 + $0xb] ss:$0 sm:$0xff]  ;;  %v2348_v17 = vld [vmem:[#allocation6 + $0xf] ss:$0 sm:$0xff] }
  0x53   : > { %v2346_v18 = vld [vmem:[#allocation6 + $0xd] ss:$0 sm:$0xff]  ;;  %v2349_v19 = vld [vmem:[#allocation6 + $0x10] ss:$0 sm:$0xff]  ;;  %vm229_vm3 = vcmask 1047747   ;;  %vm231_vm4 = vcmask 195587  }
  0x54   : > { %222 = vrot.lane.b32.xlu0 %v219_v8, %s2597_s28  ;;  %vm237_vm5 = vcmask 1042624   ;;  %vm239_vm6 = vcmask 190464   ;;  %vm233_vm7 = vcmask 1047744   ;;  %vm235_vm8 = vcmask 195584   ;;  %s2601_s25 = smov 120   ;;  %s2602_s4 = smov 112  }
  0x55   : > { %224 = vrot.lane.b32.xlu1 %v218_v7, %s2597_s28  ;;  %s2603_s8 = smov 104   ;;  %s2604_s9 = smov 96   ;;  %v2340_v52 = vld [vmem:[#allocation6 + $0x7] ss:$0 sm:$0xff]  ;;  %vm468_vm9 = vcmask 1046528   ;;  %vm763_vm10 = vcmask 1045504  }
  0x56   : > { %s2605_s7 = smov 88   ;;  %s2606_s10 = smov 80   ;;  %vm286_vm11 = vcmask 982016   ;;  %vm318_vm12 = vcmask 916480   ;;  %vm350_vm13 = vcmask 850944   ;;  %vm382_vm14 = vcmask 785408  }
  0x57   : > { %vm414_vm15 = vcmask 719872   ;;  %vm446_vm0 = vcmask 654336   ;;  %vm1058_vm1 = vcmask 1044480   ;;  %s203_s30 = scalar_lea.vmem [#allocation8], %s2329_s27  ;;  %p4028_p11 = scmp.ne.s32.totalorder %s3944_s6, 0 }
  0x58   : > { %363 = vrot.lane.b32.xlu0 %v2337_v10, %s2599_s17  ;;  %s2238_s23 = sshll.u32 %s203_s30, 4  ;;  %s3877_s23 = int_to_ptr.vmem [resolvable:$true] %s2238_s23 }
  0x59   : > { %395 = vrot.lane.b32.xlu1 %v2338_v9, %s2598_s29 }
  0x5c   : > { %427 = vrot.lane.b32.xlu0 %v2339_v12, %s2600_s22 }
  0x5d   : > { %484 = vrot.lane.b32.xlu1 %v2341_v11, %s2596_s18 }
  0x60   : > { %529 = vrot.lane.b32.xlu0 %v2342_v14, %s2595_s20 }
  0x61   : > { %574 = vrot.lane.b32.xlu1 %v2343_v13, %s2597_s28 }
  0x64   : > { %619 = vrot.lane.b32.xlu0 %v2344_v16, %s2599_s17 }
  0x65   : > { %664 = vrot.lane.b32.xlu1 %v2345_v15, %s2598_s29 }
  0x68   : > { %709 = vrot.lane.b32.xlu0 %v2346_v18, %s2600_s22 }
  0x69   : > { %779 = vrot.lane.b32.xlu1 %v2348_v17, %s2596_s18 }
  0x6c   : > { %824 = vrot.lane.b32.xlu0 %v2349_v19, %s2595_s20 }
  0xbe   : > { %v300_v20 = vpop.permute.xlu0 %299 }
  0xbf   : > { %v268_v21 = vpop.permute.xlu1 %267 }
  0xc2   : > { %v221_v23 = vpop.permute.xlu0 %220 }
  0xc3   : > { %v332_v22 = vpop.permute.xlu1 %331  ;;  %230 = vst.msk [vmem:[#allocation2] sm:$0xf8] %vm229_vm3, %v221_v23  ;;  %vm1353_vm3 = vcmask 1043456  }
  0xc4   : > { %232 = vst.msk [vmem:[#allocation2 + $0x8] sm:$0xf8] %vm231_vm4, %v221_v23  ;;  %vm1942_vm4 = vcmask 1041408  }
  0xc6   : > { %v223_v25 = vpop.permute.xlu0 %222 }
  0xc7   : > { %v225_v24 = vpop.permute.xlu1 %224  ;;  %234 = vst.msk [vmem:[#allocation2 + $0x10] sm:$0xff] %vm233_vm7, %v223_v25 }
  0xc8   : > { %238 = vst.msk [vmem:[#allocation2 + $0x20] sm:$0x7] %vm237_vm5, %v225_v24 }
  0xc9   : > { %240 = vst.msk [vmem:[#allocation2 + $0x28] sm:$0x7] %vm239_vm6, %v225_v24 }
  0xca   : > { %236 = vst.msk [vmem:[#allocation2 + $0x18] sm:$0xff] %vm235_vm8, %v223_v25  ;;  %v2783_v27 = vld [vmem:[#allocation2] sm:$0xff]  ;;  %v364_v34 = vpop.permute.xlu0 %363 }
  0xcb   : > { %v249_v26 = vld [vmem:[#allocation2 + $0x8] sm:$0xff]  ;;  %v270_v29 = vmul.f32 %v268_v21, %v2783_v27  ;;  %v302_v30 = vmul.f32 %v300_v20, %v2783_v27  ;;  %v334_v33 = vmul.f32 %v332_v22, %v2783_v27  ;;  %v366_v35 = vmul.f32 %v364_v34, %v2783_v27  ;;  %v396_v37 = vpop.permute.xlu1 %395  ;;  %v2817_v51 = vld [vmem:[#allocation2] sm:$0xfe] }
  0xcc   : > { %v271_v28 = vmul.f32 %v268_v21, %v249_v26  ;;  %v303_v31 = vmul.f32 %v300_v20, %v249_v26  ;;  %v335_v32 = vmul.f32 %v332_v22, %v249_v26  ;;  %v367_v36 = vmul.f32 %v364_v34, %v249_v26  ;;  %v2831_v61 = vld [vmem:[#allocation2 + $0x8] sm:$0xfe] }
  0xcd   : > { %278 = vrot.lane.b32.xlu0 %v270_v29, %s2601_s25  ;;  %v399_v38 = vmul.f32 %v396_v37, %v249_v26  ;;  %v398_v39 = vmul.f32 %v396_v37, %v2783_v27  ;;  %v462_v55 = vmul.f32 %v2340_v52, %v2817_v51 }
  0xce   : > { %280 = vrot.lane.b32.xlu1 %v271_v28, %s2601_s25  ;;  %v428_v40 = vpop.permute.xlu0 %427  ;;  %v2801_v43 = vld [vmem:[#allocation2 + $0x10] sm:$0xff] }
  0xcf   : > { %v430_v41 = vmul.f32 %v428_v40, %v2783_v27  ;;  %v431_v42 = vmul.f32 %v428_v40, %v249_v26  ;;  %v272_v46 = vmul.f32 %v268_v21, %v2801_v43  ;;  %v304_v47 = vmul.f32 %v300_v20, %v2801_v43  ;;  %v2824_v56 = vld [vmem:[#allocation2 + $0x20] sm:$0x1]  ;;  %v485_v57 = vpop.permute.xlu1 %484 }
  0xd0   : > { %v336_v50 = vmul.f32 %v332_v22, %v2801_v43  ;;  %v368_v53 = vmul.f32 %v364_v34, %v2801_v43  ;;  %v463_v58 = vmul.f32 %v2340_v52, %v2801_v43  ;;  %v400_v60 = vmul.f32 %v396_v37, %v2801_v43  ;;  %v2838_v5 = vld [vmem:[#allocation2 + $0x28] sm:$0x1] }
  0xd1   : > { %312 = vrot.lane.b32.xlu0 %v303_v31, %s2602_s4  ;;  %v2803_v44 = vld [vmem:[#allocation2 + $0x18] sm:$0xff]  ;;  %v469_v62 = vrot.slane %v462_v55, 1  ;;  %v464_v0 = vmul.f32 %v2340_v52, %v2824_v56  ;;  %v488_v1 = vmul.f32 %v485_v57, %v2831_v61  ;;  %v487_v3 = vmul.f32 %v485_v57, %v2817_v51 }
  0xd2   : > { %310 = vrot.lane.b32.xlu1 %v302_v30, %s2602_s4  ;;  %v273_v45 = vmul.f32 %v268_v21, %v2803_v44  ;;  %v305_v48 = vmul.f32 %v300_v20, %v2803_v44  ;;  %v337_v49 = vmul.f32 %v332_v22, %v2803_v44  ;;  %v369_v54 = vmul.f32 %v364_v34, %v2803_v44  ;;  %v530_v13 = vpop.permute.xlu0 %529 }
  0xd3   : > { %v401_v59 = vmul.f32 %v396_v37, %v2803_v44  ;;  %v470_v63 = vrot.slane %v463_v58, 1  ;;  %v490_v2 = vmul.f32 %v485_v57, %v2803_v44  ;;  %v489_v4 = vmul.f32 %v485_v57, %v2801_v43  ;;  %v575_v31 = vpop.permute.xlu1 %574 }
  0xd4   : > { %v472_v7 = vrot.slane %v464_v0, 1  ;;  %v432_v8 = vmul.f32 %v428_v40, %v2801_v43  ;;  %v433_v9 = vmul.f32 %v428_v40, %v2803_v44  ;;  %v492_v10 = vmul.f32 %v485_v57, %v2838_v5 }
  0xd5   : > { %342 = vrot.lane.b32.xlu0 %v334_v33, %s2603_s8  ;;  %v2843_v6 = vsel %vm468_vm9, %v469_v62, %v470_v63  ;;  %v491_v11 = vmul.f32 %v485_v57, %v2824_v56  ;;  %v502_v14 = vrot.slane %v488_v1, 1  ;;  %v503_v15 = vrot.slane %v490_v2, 1 }
  0xd6   : > { %344 = vrot.lane.b32.xlu1 %v335_v32, %s2603_s8  ;;  %v2850_v12 = vsel %vm468_vm9, %v470_v63, %v472_v7  ;;  %v499_v16 = vrot.slane %v487_v3, 1  ;;  %v500_v17 = vrot.slane %v489_v4, 1  ;;  %v507_v18 = vrot.slane %v492_v10, 1 }
  0xd7   : > { %v505_v19 = vrot.slane %v491_v11, 1  ;;  %v532_v20 = vmul.f32 %v530_v13, %v2817_v51  ;;  %v534_v21 = vmul.f32 %v530_v13, %v2801_v43  ;;  %v504_v22 = vsel %vm468_vm9, %v502_v14, %v503_v15 }
  0xd8   : > { %v501_v23 = vsel %vm468_vm9, %v499_v16, %v500_v17  ;;  %v533_v24 = vmul.f32 %v530_v13, %v2831_v61  ;;  %v535_v25 = vmul.f32 %v530_v13, %v2803_v44  ;;  %v508_v26 = vsel %vm468_vm9, %v503_v15, %v507_v18 }
  0xd9   : > { %376 = vrot.lane.b32.xlu0 %v367_v36, %s2604_s9  ;;  %v544_v28 = vrot.slane %v532_v20, 1  ;;  %v545_v29 = vrot.slane %v534_v21, 1  ;;  %v536_v30 = vmul.f32 %v530_v13, %v2824_v56  ;;  %v506_v32 = vsel %vm468_vm9, %v500_v17, %v505_v19 }
  0xda   : > { %374 = vrot.lane.b32.xlu1 %v366_v35, %s2604_s9  ;;  %v547_v33 = vrot.slane %v533_v24, 1  ;;  %v548_v34 = vrot.slane %v535_v25, 1  ;;  %v537_v35 = vmul.f32 %v530_v13, %v2838_v5  ;;  %v581_v55 = vmul.f32 %v575_v31, %v2824_v56 }
  0xdb   : > { %v546_v36 = vsel %vm468_vm9, %v544_v28, %v545_v29  ;;  %v550_v37 = vrot.slane %v536_v30, 1 }
  0xdc   : > { %v549_v40 = vsel %vm468_vm9, %v547_v33, %v548_v34  ;;  %v595_v63 = vrot.slane %v581_v55, 1 }
  0xdd   : > { %406 = vrot.lane.b32.xlu0 %v398_v39, %s2605_s7  ;;  %v580_v39 = vmul.f32 %v575_v31, %v2803_v44 }
  0xde   : > { %408 = vrot.lane.b32.xlu1 %v399_v38, %s2605_s7  ;;  %v578_v38 = vmul.f32 %v575_v31, %v2831_v61 }
  0xe1   : > { %440 = vrot.lane.b32.xlu0 %v431_v42, %s2606_s10  ;;  %v577_v42 = vmul.f32 %v575_v31, %v2817_v51 }
  0xe2   : > { %438 = vrot.lane.b32.xlu1 %v430_v41, %s2606_s10  ;;  %v552_v41 = vrot.slane %v537_v35, 1 }
  0xe4   : > { %v553_v52 = vsel %vm468_vm9, %v548_v34, %v552_v41 }
  0xe5   : > { %282 = vrot.lane.b32.xlu0 %v272_v46, %s2601_s25  ;;  %v551_v46 = vsel %vm468_vm9, %v545_v29, %v550_v37 }
  0xe6   : > { %284 = vrot.lane.b32.xlu1 %v273_v45, %s2601_s25  ;;  %v579_v45 = vmul.f32 %v575_v31, %v2801_v43 }
  0xe9   : > { %316 = vrot.lane.b32.xlu0 %v305_v48, %s2602_s4  ;;  %v593_v48 = vrot.slane %v580_v39, 1 }
  0xea   : > { %314 = vrot.lane.b32.xlu1 %v304_v47, %s2602_s4  ;;  %v592_v47 = vrot.slane %v578_v38, 1 }
  0xec   : > { %v594_v57 = vsel %vm468_vm9, %v592_v47, %v593_v48 }
  0xed   : > { %346 = vrot.lane.b32.xlu0 %v336_v50, %s2603_s8  ;;  %v620_v50 = vpop.permute.xlu0 %619 }
  0xee   : > { %348 = vrot.lane.b32.xlu1 %v337_v49, %s2603_s8  ;;  %v582_v49 = vmul.f32 %v575_v31, %v2838_v5  ;;  %v623_v0 = vmul.f32 %v620_v50, %v2831_v61  ;;  %v625_v1 = vmul.f32 %v620_v50, %v2803_v44  ;;  %v626_v7 = vmul.f32 %v620_v50, %v2824_v56 }
  0xef   : > { %v627_v13 = vmul.f32 %v620_v50, %v2838_v5 }
  0xf0   : > { %v597_v58 = vrot.slane %v582_v49, 1  ;;  %v637_v10 = vrot.slane %v623_v0, 1  ;;  %v638_v11 = vrot.slane %v625_v1, 1  ;;  %v640_v15 = vrot.slane %v626_v7, 1 }
  0xf1   : > { %380 = vrot.lane.b32.xlu0 %v369_v54, %s2604_s9  ;;  %v590_v54 = vrot.slane %v579_v45, 1  ;;  %v642_v19 = vrot.slane %v627_v13, 1 }
  0xf2   : > { %378 = vrot.lane.b32.xlu1 %v368_v53, %s2604_s9  ;;  %v589_v53 = vrot.slane %v577_v42, 1  ;;  %v598_v2 = vsel %vm468_vm9, %v593_v48, %v597_v58  ;;  %v639_v18 = vsel %vm468_vm9, %v637_v10, %v638_v11 }
  0xf3   : > { %v643_v28 = vsel %vm468_vm9, %v638_v11, %v642_v19 }
  0xf4   : > { %v591_v62 = vsel %vm468_vm9, %v589_v53, %v590_v54 }
  0xf5   : > { %410 = vrot.lane.b32.xlu0 %v400_v60, %s2605_s7  ;;  %v624_v60 = vmul.f32 %v620_v50, %v2801_v43 }
  0xf6   : > { %412 = vrot.lane.b32.xlu1 %v401_v59, %s2605_s7  ;;  %v622_v59 = vmul.f32 %v620_v50, %v2817_v51 }
  0xf7   : > { %v635_v4 = vrot.slane %v624_v60, 1  ;;  %v2938_v60 = vld [vmem:[#allocation2 + $0x20] sm:$0x3] }
  0xf8   : > { %v634_v3 = vrot.slane %v622_v59, 1  ;;  %v2934_v59 = vld [vmem:[#allocation2 + $0x28] sm:$0x3] }
  0xf9   : > { %444 = vrot.lane.b32.xlu0 %v433_v9, %s2606_s10  ;;  %v596_v9 = vsel %vm468_vm9, %v590_v54, %v595_v63  ;;  %v2929_v54 = vld [vmem:[#allocation2] sm:$0xfc] }
  0xfa   : > { %442 = vrot.lane.b32.xlu1 %v432_v8, %s2606_s10  ;;  %v665_v8 = vpop.permute.xlu1 %664  ;;  %v636_v14 = vsel %vm468_vm9, %v634_v3, %v635_v4 }
  0xfb   : > { %v668_v16 = vmul.f32 %v665_v8, %v2831_v61  ;;  %v670_v17 = vmul.f32 %v665_v8, %v2803_v44  ;;  %v667_v20 = vmul.f32 %v665_v8, %v2817_v51  ;;  %v669_v21 = vmul.f32 %v665_v8, %v2801_v43 }
  0xfc   : > { %v672_v25 = vmul.f32 %v665_v8, %v2838_v5  ;;  %v671_v31 = vmul.f32 %v665_v8, %v2824_v56 }
  0xfd   : > { %509 = vrot.lane.b32.xlu0 %v501_v23, %s2601_s25  ;;  %v682_v23 = vrot.slane %v668_v16, 1  ;;  %v683_v24 = vrot.slane %v670_v17, 1  ;;  %v679_v29 = vrot.slane %v667_v20, 1  ;;  %v680_v30 = vrot.slane %v669_v21, 1 }
  0xfe   : > { %511 = vrot.lane.b32.xlu1 %v504_v22, %s2601_s25  ;;  %v641_v22 = vsel %vm468_vm9, %v635_v4, %v640_v15  ;;  %v687_v33 = vrot.slane %v672_v25, 1  ;;  %v685_v37 = vrot.slane %v671_v31, 1 }
 0x101   : > { %513 = vrot.lane.b32.xlu0 %v506_v32, %s2601_s25  ;;  %v684_v32 = vsel %vm468_vm9, %v682_v23, %v683_v24 }
 0x102   : > { %515 = vrot.lane.b32.xlu1 %v508_v26, %s2601_s25  ;;  %v710_v26 = vpop.permute.xlu0 %709 }
 0x103   : > { %v712_v34 = vmul.f32 %v710_v26, %v2817_v51  ;;  %v714_v35 = vmul.f32 %v710_v26, %v2801_v43  ;;  %v713_v38 = vmul.f32 %v710_v26, %v2831_v61  ;;  %v715_v39 = vmul.f32 %v710_v26, %v2803_v44  ;;  %v780_v51 = vpop.permute.xlu1 %779  ;;  %v2924_v61 = vld [vmem:[#allocation2 + $0x8] sm:$0xfc] }
 0x104   : > { %v716_v45 = vmul.f32 %v710_v26, %v2824_v56  ;;  %v717_v49 = vmul.f32 %v710_v26, %v2838_v5  ;;  %v783_v53 = vmul.f32 %v780_v51, %v2924_v61  ;;  %v785_v56 = vmul.f32 %v780_v51, %v2803_v44 }
 0x105   : > { %556 = vrot.lane.b32.xlu0 %v549_v40, %s2602_s4  ;;  %v688_v40 = vsel %vm468_vm9, %v683_v24, %v687_v33  ;;  %v724_v41 = vrot.slane %v712_v34, 1  ;;  %v725_v42 = vrot.slane %v714_v35, 1  ;;  %v727_v47 = vrot.slane %v713_v38, 1  ;;  %v2350_v33 = vld [vmem:[#allocation6 + $0x11] ss:$0 sm:$0xff] }
 0x106   : > { %554 = vrot.lane.b32.xlu1 %v546_v36, %s2602_s4  ;;  %v681_v36 = vsel %vm468_vm9, %v679_v29, %v680_v30  ;;  %v728_v48 = vrot.slane %v715_v39, 1  ;;  %v782_v5 = vmul.f32 %v780_v51, %v2929_v54  ;;  %v784_v58 = vmul.f32 %v780_v51, %v2801_v43 }
 0x107   : > { %v726_v50 = vsel %vm468_vm9, %v724_v41, %v725_v42  ;;  %v797_v63 = vrot.slane %v783_v53, 2  ;;  %v798_v0 = vrot.slane %v785_v56, 2  ;;  %v787_v1 = vmul.f32 %v780_v51, %v2934_v59 }
 0x108   : > { %v729_v55 = vsel %vm468_vm9, %v727_v47, %v728_v48  ;;  %v794_v4 = vrot.slane %v782_v5, 2  ;;  %v795_v7 = vrot.slane %v784_v58, 2  ;;  %v786_v8 = vmul.f32 %v780_v51, %v2938_v60 }
 0x109   : > { %560 = vrot.lane.b32.xlu0 %v553_v52, %s2602_s4  ;;  %v730_v52 = vrot.slane %v716_v45, 1 }
 0x10a   : > { %558 = vrot.lane.b32.xlu1 %v551_v46, %s2602_s4  ;;  %v686_v46 = vsel %vm468_vm9, %v680_v30, %v685_v37  ;;  %v796_v15 = vsel %vm763_vm10, %v794_v4, %v795_v7  ;;  %v800_v16 = vrot.slane %v786_v8, 2 }
 0x10d   : > { %599 = vrot.lane.b32.xlu0 %v591_v62, %s2603_s8  ;;  %v731_v62 = vsel %vm468_vm9, %v725_v42, %v730_v52 }
 0x10e   : > { %601 = vrot.lane.b32.xlu1 %v594_v57, %s2603_s8  ;;  %v732_v57 = vrot.slane %v717_v49, 1 }
 0x110   : > { %v733_v3 = vsel %vm468_vm9, %v728_v48, %v732_v57 }
 0x111   : > { %603 = vrot.lane.b32.xlu0 %v596_v9, %s2603_s8  ;;  %v802_v9 = vrot.slane %v787_v1, 2 }
 0x112   : > { %605 = vrot.lane.b32.xlu1 %v598_v2, %s2603_s8  ;;  %v825_v2 = vpop.permute.xlu0 %824 }
 0x113   : > { %v827_v10 = vmul.f32 %v825_v2, %v2929_v54  ;;  %v829_v11 = vmul.f32 %v825_v2, %v2801_v43  ;;  %v828_v13 = vmul.f32 %v825_v2, %v2924_v61  ;;  %v830_v17 = vmul.f32 %v825_v2, %v2803_v44 }
 0x114   : > { %v831_v24 = vmul.f32 %v825_v2, %v2938_v60  ;;  %v832_v25 = vmul.f32 %v825_v2, %v2934_v59 }
 0x115   : > { %646 = vrot.lane.b32.xlu0 %v639_v18, %s2604_s9  ;;  %v803_v18 = vsel %vm763_vm10, %v798_v0, %v802_v9  ;;  %v839_v19 = vrot.slane %v827_v10, 2  ;;  %v840_v20 = vrot.slane %v829_v11, 2  ;;  %v842_v21 = vrot.slane %v828_v13, 2 }
 0x116   : > { %644 = vrot.lane.b32.xlu1 %v636_v14, %s2604_s9  ;;  %v799_v14 = vsel %vm763_vm10, %v797_v63, %v798_v0  ;;  %v843_v23 = vrot.slane %v830_v17, 2  ;;  %v845_v29 = vrot.slane %v831_v24, 2  ;;  %v847_v30 = vrot.slane %v832_v25, 2 }
 0x117   : > { %v841_v26 = vsel %vm763_vm10, %v839_v19, %v840_v20 }
 0x118   : > { %v846_v31 = vsel %vm763_vm10, %v840_v20, %v845_v29 }
 0x119   : > { %650 = vrot.lane.b32.xlu0 %v643_v28, %s2604_s9  ;;  %v844_v28 = vsel %vm763_vm10, %v842_v21, %v843_v23 }
 0x11a   : > { %648 = vrot.lane.b32.xlu1 %v641_v22, %s2604_s9  ;;  %v801_v22 = vsel %vm763_vm10, %v795_v7, %v800_v16 }
 0x11d   : > { %689 = vrot.lane.b32.xlu0 %v681_v36, %s2605_s7  ;;  %v2969_v36 = vld [vmem:[#allocation6] ss:$0 sm:$0xff] }
 0x11e   : > { %691 = vrot.lane.b32.xlu1 %v684_v32, %s2605_s7  ;;  %v848_v32 = vsel %vm763_vm10, %v843_v23, %v847_v30  ;;  %v257_v39 = vmul.f32 %v2969_v36, %v2783_v27 }
 0x121   : > { %693 = vrot.lane.b32.xlu0 %v686_v46, %s2605_s7 }
 0x122   : > { %695 = vrot.lane.b32.xlu1 %v688_v40, %s2605_s7  ;;  %v2976_v40 = vld [vmem:[%s3929_s2] ss:$0 sm:$0xff] }
 0x123   : > { %v259_v51 = vadd.f32 %v2976_v40, %v257_v39 }
 0x125   : > { %736 = vrot.lane.b32.xlu0 %v729_v55, %s2606_s10 }
 0x126   : > { %734 = vrot.lane.b32.xlu1 %v726_v50, %s2606_s10 }
 0x129   : > { %740 = vrot.lane.b32.xlu0 %v733_v3, %s2606_s10 }
 0x12a   : > { %738 = vrot.lane.b32.xlu1 %v731_v62, %s2606_s10 }
 0x12d   : > { %804 = vrot.lane.b32.xlu0 %v796_v15, %s2601_s25 }
 0x12e   : > { %806 = vrot.lane.b32.xlu1 %v799_v14, %s2601_s25 }
 0x131   : > { %808 = vrot.lane.b32.xlu0 %v801_v22, %s2601_s25 }
 0x132   : > { %810 = vrot.lane.b32.xlu1 %v803_v18, %s2601_s25 }
 0x135   : > { %851 = vrot.lane.b32.xlu0 %v844_v28, %s2602_s4 }
 0x136   : > { %849 = vrot.lane.b32.xlu1 %v841_v26, %s2602_s4 }
 0x139   : > { %855 = vrot.lane.b32.xlu0 %v848_v32, %s2602_s4 }
 0x13a   : > { %853 = vrot.lane.b32.xlu1 %v846_v31, %s2602_s4 }
 0x13e   : > { %869 = vrot.lane.b32.xlu1 %v2350_v33, %s2597_s28 }
 0x13f   : > { %v279_v35 = vpop.permute.xlu0 %278 }
 0x140   : > { %v281_v34 = vpop.permute.xlu1 %280 }
 0x141   : > { %v287_v45 = vsel %vm286_vm11, %v279_v35, %v281_v34 }
 0x142   : > { %v291_v47 = vadd.f32 %v287_v45, %v259_v51 }
 0x143   : > { %v313_v38 = vpop.permute.xlu0 %312 }
 0x144   : > { %v311_v37 = vpop.permute.xlu1 %310 }
 0x145   : > { %v319_v46 = vsel %vm318_vm12, %v311_v37, %v313_v38 }
 0x146   : > { %v323_v50 = vadd.f32 %v319_v46, %v291_v47 }
 0x147   : > { %v343_v42 = vpop.permute.xlu0 %342 }
 0x148   : > { %v345_v41 = vpop.permute.xlu1 %344 }
 0x149   : > { %v351_v27 = vsel %vm350_vm13, %v343_v42, %v345_v41 }
 0x14a   : > { %v355_v53 = vadd.f32 %v351_v27, %v323_v50 }
 0x14b   : > { %v377_v49 = vpop.permute.xlu0 %376 }
 0x14c   : > { %v375_v48 = vpop.permute.xlu1 %374 }
 0x14d   : > { %v383_v52 = vsel %vm382_vm14, %v375_v48, %v377_v49 }
 0x14e   : > { %v387_v5 = vadd.f32 %v383_v52, %v355_v53  ;;  %v2351_v52 = vld [vmem:[#allocation6 + $0x12] ss:$0 sm:$0xff] }
 0x14f   : > { %v407_v55 = vpop.permute.xlu0 %406 }
 0x150   : > { %v409_v56 = vpop.permute.xlu1 %408 }
 0x151   : > { %v415_v57 = vsel %vm414_vm15, %v407_v55, %v409_v56 }
 0x152   : > { %v419_v58 = vadd.f32 %v415_v57, %v387_v5 }
 0x153   : > { %v441_v63 = vpop.permute.xlu0 %440 }
 0x154   : > { %v439_v62 = vpop.permute.xlu1 %438 }
 0x155   : > { %v447_v0 = vsel %vm446_vm0, %v439_v62, %v441_v63 }
 0x156   : > { %v451_v1 = vadd.f32 %v447_v0, %v419_v58 }
 0x157   : > { %v3028_v25 = vpop.permute.xlu0 %282 }
 0x158   : > { %v2986_v2 = vadd.f32 %v2843_v6, %v451_v1  ;;  %v2988_v3 = vpop.permute.xlu1 %284 }
 0x15b   : > { %v3032_v28 = vpop.permute.xlu0 %316 }
 0x15c   : > { %v2990_v4 = vpop.permute.xlu1 %314 }
 0x15f   : > { %v3040_v35 = vpop.permute.xlu0 %346 }
 0x160   : > { %v2992_v7 = vpop.permute.xlu1 %348 }
 0x163   : > { %v3048_v49 = vpop.permute.xlu0 %380 }
 0x164   : > { %v2994_v8 = vpop.permute.xlu1 %378 }
 0x167   : > { %v3054_v53 = vpop.permute.xlu0 %410 }
 0x168   : > { %v2996_v9 = vpop.permute.xlu1 %412 }
 0x16b   : > { %v3057_v56 = vpop.permute.xlu0 %444 }
 0x16c   : > { %v2998_v10 = vpop.permute.xlu1 %442 }
 0x16f   : > { %v3059_v55 = vpop.permute.xlu0 %509 }
 0x170   : > { %v3000_v11 = vpop.permute.xlu1 %511 }
 0x173   : > { %v3061_v57 = vpop.permute.xlu0 %513 }
 0x174   : > { %v3002_v13 = vpop.permute.xlu1 %515 }
 0x177   : > { %v3063_v5 = vpop.permute.xlu0 %556 }
 0x178   : > { %v3004_v14 = vpop.permute.xlu1 %554 }
 0x17b   : > { %v3065_v58 = vpop.permute.xlu0 %560 }
 0x17c   : > { %v3006_v6 = vpop.permute.xlu1 %558 }
 0x17f   : > { %v3067_v62 = vpop.permute.xlu0 %599 }
 0x180   : > { %v3008_v15 = vpop.permute.xlu1 %601 }
 0x183   : > { %v3069_v63 = vpop.permute.xlu0 %603 }
 0x184   : > { %v3010_v16 = vpop.permute.xlu1 %605 }
 0x187   : > { %v3071_v0 = vpop.permute.xlu0 %646 }
 0x188   : > { %v3012_v17 = vpop.permute.xlu1 %644 }
 0x18b   : > { %v3073_v1 = vpop.permute.xlu0 %650 }
 0x18c   : > { %v3014_v18 = vpop.permute.xlu1 %648 }
 0x190   : > { %v3016_v19 = vpop.permute.xlu1 %691 }
 0x194   : > { %v3018_v20 = vpop.permute.xlu1 %695 }
 0x198   : > { %v3020_v21 = vpop.permute.xlu1 %734 }
 0x19c   : > { %v3022_v22 = vpop.permute.xlu1 %738 }
 0x19d   : > { %3950 = vst [vmem:[#allocation12_spill] sm:$0xff] %v3022_v22 }
 0x1a0   : > { %v3024_v23 = vpop.permute.xlu1 %806 }
 0x1a1   : > { %3951 = vst [vmem:[#allocation13_spill] sm:$0xff] %v3024_v23 }
 0x1a4   : > { %v3026_v24 = vpop.permute.xlu1 %810 }
 0x1a5   : > { %3952 = vst [vmem:[#allocation14_spill] sm:$0xff] %v3026_v24 }
 0x1a8   : > { %v3030_v26 = vpop.permute.xlu1 %849 }
 0x1a9   : > { %3953 = vst [vmem:[#allocation15_spill] sm:$0xff] %v3030_v26 }
 0x1ac   : > { %v3034_v29 = vpop.permute.xlu1 %853 }
 0x1ad   : > { %3954 = vst [vmem:[#allocation16_spill] sm:$0xff] %v3034_v29 }
 0x1b0   : > { %v870_v30 = vpop.permute.xlu1 %869 }
 0x1b1   : > { %v873_v31 = vmul.f32 %v870_v30, %v2924_v61  ;;  %v875_v32 = vmul.f32 %v870_v30, %v2803_v44  ;;  %v872_v33 = vmul.f32 %v870_v30, %v2929_v54  ;;  %v874_v34 = vmul.f32 %v870_v30, %v2801_v43 }
 0x1b2   : > { %v877_v37 = vmul.f32 %v870_v30, %v2934_v59  ;;  %v876_v38 = vmul.f32 %v870_v30, %v2938_v60  ;;  %v3075_v30 = vpop.permute.xlu0 %689 }
 0x1b3   : > { %v887_v39 = vrot.slane %v873_v31, 2  ;;  %v888_v41 = vrot.slane %v875_v32, 2  ;;  %v884_v42 = vrot.slane %v872_v33, 2  ;;  %v885_v45 = vrot.slane %v874_v34, 2 }
 0x1b4   : > { %v892_v47 = vrot.slane %v877_v37, 2  ;;  %v890_v48 = vrot.slane %v876_v38, 2 }
 0x1b5   : > { %v889_v51 = vsel %vm763_vm10, %v887_v39, %v888_v41  ;;  %v886_v46 = vsel %vm763_vm10, %v884_v42, %v885_v45 }
 0x1b6   : > { %896 = vrot.lane.b32.xlu1 %v889_v51, %s2603_s8  ;;  %894 = vrot.lane.b32.xlu0 %v886_v46, %s2603_s8  ;;  %v893_v27 = vsel %vm763_vm10, %v888_v41, %v892_v47  ;;  %v891_v50 = vsel %vm763_vm10, %v885_v45, %v890_v48  ;;  %v3077_v31 = vpop.permute.xlu0 %693 }
 0x1ba   : > { %900 = vrot.lane.b32.xlu1 %v893_v27, %s2603_s8  ;;  %898 = vrot.lane.b32.xlu0 %v891_v50, %s2603_s8  ;;  %v3079_v32 = vpop.permute.xlu0 %736 }
 0x1be   : > { %914 = vrot.lane.b32.xlu0 %v2351_v52, %s2599_s17  ;;  %v3081_v33 = vpop.permute.xlu0 %740 }
 0x1c2   : > { %v3083_v34 = vpop.permute.xlu0 %804 }
 0x1c3   : > { %3955 = vst [vmem:[#allocation17_spill] sm:$0xff] %v3083_v34 }
 0x1c6   : > { %v3085_v37 = vpop.permute.xlu0 %808 }
 0x1c7   : > { %3956 = vst [vmem:[#allocation18_spill] sm:$0xff] %v3085_v37 }
 0x1ca   : > { %v3087_v38 = vpop.permute.xlu0 %851 }
 0x1cb   : > { %3957 = vst [vmem:[#allocation19_spill] sm:$0xff] %v3087_v38 }
 0x1ce   : > { %v3089_v39 = vpop.permute.xlu0 %855 }
 0x1cf   : > { %3958 = vst [vmem:[#allocation20_spill] sm:$0xff] %v3089_v39 }
 0x228   : > { %v3091_v41 = vpop.permute.xlu0 %894 }
 0x229   : > { %3959 = vst [vmem:[#allocation21_spill] sm:$0xff] %v3091_v41 }
 0x22c   : > { %v3093_v42 = vpop.permute.xlu0 %898 }
 0x22d   : > { %3960 = vst [vmem:[#allocation22_spill] sm:$0xff] %v3093_v42 }
 0x230   : > { %v915_v45 = vpop.permute.xlu0 %914 }
 0x231   : > { %v918_v51 = vmul.f32 %v915_v45, %v2924_v61  ;;  %v920_v46 = vmul.f32 %v915_v45, %v2803_v44  ;;  %v917_v47 = vmul.f32 %v915_v45, %v2929_v54  ;;  %v919_v48 = vmul.f32 %v915_v45, %v2801_v43 }
 0x232   : > { %v922_v27 = vmul.f32 %v915_v45, %v2934_v59  ;;  %v921_v50 = vmul.f32 %v915_v45, %v2938_v60  ;;  %v2352_v45 = vld [vmem:[#allocation6 + $0x13] ss:$0 sm:$0xff] }
 0x233   : > { %v932_v52 = vrot.slane %v918_v51, 2  ;;  %v933_v29 = vrot.slane %v920_v46, 2  ;;  %v929_v39 = vrot.slane %v917_v47, 2  ;;  %v930_v37 = vrot.slane %v919_v48, 2  ;;  %v3110_v51 = vpop.permute.xlu1 %896 }
 0x234   : > { %v937_v24 = vrot.slane %v922_v27, 2  ;;  %v935_v26 = vrot.slane %v921_v50, 2  ;;  %3961 = vst [vmem:[#allocation23_spill] sm:$0xff] %v3110_v51 }
 0x235   : > { %v934_v41 = vsel %vm763_vm10, %v932_v52, %v933_v29  ;;  %v931_v42 = vsel %vm763_vm10, %v929_v39, %v930_v37 }
 0x236   : > { %941 = vrot.lane.b32.xlu0 %v934_v41, %s2604_s9  ;;  %939 = vrot.lane.b32.xlu1 %v931_v42, %s2604_s9  ;;  %v938_v38 = vsel %vm763_vm10, %v933_v29, %v937_v24  ;;  %v936_v34 = vsel %vm763_vm10, %v930_v37, %v935_v26 }
 0x237   : > { %v3112_v39 = vpop.permute.xlu1 %900 }
 0x238   : > { %3962 = vst [vmem:[#allocation24_spill] sm:$0xff] %v3112_v39 }
 0x23a   : > { %945 = vrot.lane.b32.xlu0 %v938_v38, %s2604_s9  ;;  %943 = vrot.lane.b32.xlu1 %v936_v34, %s2604_s9 }
 0x23e   : > { %959 = vrot.lane.b32.xlu1 %v2352_v45, %s2598_s29 }
 0x2a8   : > { %v3114_v46 = vpop.permute.xlu1 %939 }
 0x2a9   : > { %3963 = vst [vmem:[#allocation25_spill] sm:$0xff] %v3114_v46 }
 0x2ac   : > { %v3116_v41 = vpop.permute.xlu1 %943 }
 0x2ad   : > { %3964 = vst [vmem:[#allocation26_spill] sm:$0xff] %v3116_v41 }
 0x2b0   : > { %v960_v42 = vpop.permute.xlu1 %959 }
 0x2b1   : > { %v963_v24 = vmul.f32 %v960_v42, %v2924_v61  ;;  %v965_v26 = vmul.f32 %v960_v42, %v2803_v44  ;;  %v962_v29 = vmul.f32 %v960_v42, %v2929_v54  ;;  %v964_v34 = vmul.f32 %v960_v42, %v2801_v43 }
 0x2b2   : > { %v967_v37 = vmul.f32 %v960_v42, %v2934_v59  ;;  %v966_v38 = vmul.f32 %v960_v42, %v2938_v60  ;;  %v2353_v42 = vld [vmem:[#allocation6 + $0x14] ss:$0 sm:$0xff] }
 0x2b3   : > { %v977_v47 = vrot.slane %v963_v24, 2  ;;  %v978_v48 = vrot.slane %v965_v26, 2  ;;  %v974_v27 = vrot.slane %v962_v29, 2  ;;  %v975_v50 = vrot.slane %v964_v34, 2  ;;  %v3133_v24 = vpop.permute.xlu0 %941 }
 0x2b4   : > { %v982_v41 = vrot.slane %v967_v37, 2  ;;  %v980_v39 = vrot.slane %v966_v38, 2  ;;  %3965 = vst [vmem:[#allocation27_spill] sm:$0xff] %v3133_v24 }
 0x2b5   : > { %v979_v52 = vsel %vm763_vm10, %v977_v47, %v978_v48  ;;  %v976_v45 = vsel %vm763_vm10, %v974_v27, %v975_v50 }
 0x2b6   : > { %986 = vrot.lane.b32.xlu1 %v979_v52, %s2605_s7  ;;  %984 = vrot.lane.b32.xlu0 %v976_v45, %s2605_s7  ;;  %v983_v46 = vsel %vm763_vm10, %v978_v48, %v982_v41  ;;  %v981_v51 = vsel %vm763_vm10, %v975_v50, %v980_v39 }
 0x2b7   : > { %v3135_v26 = vpop.permute.xlu0 %945 }
 0x2b8   : > { %3966 = vst [vmem:[#allocation28_spill] sm:$0xff] %v3135_v26 }
 0x2ba   : > { %990 = vrot.lane.b32.xlu1 %v983_v46, %s2605_s7  ;;  %988 = vrot.lane.b32.xlu0 %v981_v51, %s2605_s7 }
 0x2be   : > { %1004 = vrot.lane.b32.xlu0 %v2353_v42, %s2600_s22 }
 0x328   : > { %v3137_v29 = vpop.permute.xlu0 %984 }
 0x329   : > { %3967 = vst [vmem:[#allocation29_spill] sm:$0xff] %v3137_v29 }
 0x32c   : > { %v3139_v34 = vpop.permute.xlu0 %988 }
 0x32d   : > { %3968 = vst [vmem:[#allocation30_spill] sm:$0xff] %v3139_v34 }
 0x330   : > { %v1005_v37 = vpop.permute.xlu0 %1004 }
 0x331   : > { %v1008_v41 = vmul.f32 %v1005_v37, %v2924_v61  ;;  %v1010_v39 = vmul.f32 %v1005_v37, %v2803_v44  ;;  %v1007_v46 = vmul.f32 %v1005_v37, %v2929_v54  ;;  %v1009_v51 = vmul.f32 %v1005_v37, %v2801_v43 }
 0x332   : > { %v1012_v38 = vmul.f32 %v1005_v37, %v2934_v59  ;;  %v1011_v47 = vmul.f32 %v1005_v37, %v2938_v60  ;;  %v2355_v37 = vld [vmem:[#allocation6 + $0x16] ss:$0 sm:$0xff] }
 0x333   : > { %v1022_v48 = vrot.slane %v1008_v41, 2  ;;  %v1023_v27 = vrot.slane %v1010_v39, 2  ;;  %v1019_v50 = vrot.slane %v1007_v46, 2  ;;  %v1020_v52 = vrot.slane %v1009_v51, 2  ;;  %v3156_v41 = vpop.permute.xlu1 %986 }
 0x334   : > { %v1027_v34 = vrot.slane %v1012_v38, 2  ;;  %v1025_v61 = vrot.slane %v1011_v47, 2  ;;  %3969 = vst [vmem:[#allocation31_spill] sm:$0xff] %v3156_v41  ;;  %v3164_v47 = vld [vmem:[#allocation2 + $0x8] sm:$0xf8] }
 0x335   : > { %v1024_v45 = vsel %vm763_vm10, %v1022_v48, %v1023_v27  ;;  %v1021_v42 = vsel %vm763_vm10, %v1019_v50, %v1020_v52  ;;  %3973 = vst [vmem:[#allocation35_spill] sm:$0xff] %v3164_v47 }
 0x336   : > { %1031 = vrot.lane.b32.xlu0 %v1024_v45, %s2606_s10  ;;  %1029 = vrot.lane.b32.xlu1 %v1021_v42, %s2606_s10  ;;  %v1028_v26 = vsel %vm763_vm10, %v1023_v27, %v1027_v34  ;;  %v1026_v59 = vsel %vm763_vm10, %v1020_v52, %v1025_v61  ;;  %v3166_v34 = vld [vmem:[#allocation2] sm:$0xf8]  ;;  %v3172_v52 = vld [vmem:[#allocation2 + $0x28] sm:$0x7]  ;;  %v3174_v45 = vld [vmem:[#allocation2 + $0x20] sm:$0x7] }
 0x337   : > { %v3158_v39 = vpop.permute.xlu1 %990  ;;  %3974 = vst [vmem:[#allocation36_spill] sm:$0xff] %v3172_v52 }
 0x338   : > { %3970 = vst [vmem:[#allocation32_spill] sm:$0xff] %v3158_v39 }
 0x33a   : > { %1035 = vrot.lane.b32.xlu0 %v1028_v26, %s2606_s10  ;;  %1033 = vrot.lane.b32.xlu1 %v1026_v59, %s2606_s10 }
 0x33e   : > { %1074 = vrot.lane.b32.xlu1 %v2355_v37, %s2596_s18 }
 0x3a8   : > { %v3160_v46 = vpop.permute.xlu1 %1029 }
 0x3a9   : > { %3971 = vst [vmem:[#allocation33_spill] sm:$0xff] %v3160_v46 }
 0x3ac   : > { %v3162_v51 = vpop.permute.xlu1 %1033 }
 0x3ad   : > { %3972 = vst [vmem:[#allocation34_spill] sm:$0xff] %v3162_v51 }
 0x3b0   : > { %v1075_v38 = vpop.permute.xlu1 %1074 }
 0x3b1   : > { %v1078_v26 = vmul.f32 %v1075_v38, %v3164_v47  ;;  %v1080_v48 = vmul.f32 %v1075_v38, %v2803_v44  ;;  %v1077_v27 = vmul.f32 %v1075_v38, %v3166_v34  ;;  %v1079_v50 = vmul.f32 %v1075_v38, %v2801_v43 }
 0x3b2   : > { %v1082_v42 = vmul.f32 %v1075_v38, %v3172_v52  ;;  %v1081_v61 = vmul.f32 %v1075_v38, %v3174_v45  ;;  %v2356_v38 = vld [vmem:[#allocation6 + $0x17] ss:$0 sm:$0xff] }
 0x3b3   : > { %v1092_v59 = vrot.slane %v1078_v26, 3  ;;  %v1093_v37 = vrot.slane %v1080_v48, 3  ;;  %v1089_v51 = vrot.slane %v1077_v27, 3  ;;  %v1090_v39 = vrot.slane %v1079_v50, 3  ;;  %v3187_v26 = vpop.permute.xlu0 %1031 }
 0x3b4   : > { %v1097_v41 = vrot.slane %v1082_v42, 3  ;;  %v1095_v24 = vrot.slane %v1081_v61, 3  ;;  %3975 = vst [vmem:[#allocation37_spill] sm:$0xff] %v3187_v26 }
 0x3b5   : > { %v1094_v46 = vsel %vm1058_vm1, %v1092_v59, %v1093_v37  ;;  %v1091_v29 = vsel %vm1058_vm1, %v1089_v51, %v1090_v39 }
 0x3b6   : > { %1101 = vrot.lane.b32.xlu1 %v1094_v46, %s2601_s25  ;;  %1099 = vrot.lane.b32.xlu0 %v1091_v29, %s2601_s25  ;;  %v1098_v23 = vsel %vm1058_vm1, %v1093_v37, %v1097_v41  ;;  %v1096_v22 = vsel %vm1058_vm1, %v1090_v39, %v1095_v24 }
 0x3b7   : > { %v3189_v51 = vpop.permute.xlu0 %1035 }
 0x3b8   : > { %3976 = vst [vmem:[#allocation38_spill] sm:$0xff] %v3189_v51 }
 0x3ba   : > { %1105 = vrot.lane.b32.xlu1 %v1098_v23, %s2601_s25  ;;  %1103 = vrot.lane.b32.xlu0 %v1096_v22, %s2601_s25 }
 0x3be   : > { %1119 = vrot.lane.b32.xlu0 %v2356_v38, %s2595_s20 }
 0x428   : > { %v3191_v48 = vpop.permute.xlu0 %1099 }
 0x429   : > { %3977 = vst [vmem:[#allocation39_spill] sm:$0xff] %v3191_v48 }
 0x42c   : > { %v3193_v46 = vpop.permute.xlu0 %1103 }
 0x42d   : > { %3978 = vst [vmem:[#allocation40_spill] sm:$0xff] %v3193_v46 }
 0x430   : > { %v1120_v29 = vpop.permute.xlu0 %1119 }
 0x431   : > { %v1123_v41 = vmul.f32 %v1120_v29, %v3164_v47  ;;  %v1125_v24 = vmul.f32 %v1120_v29, %v2803_v44  ;;  %v1122_v23 = vmul.f32 %v1120_v29, %v3166_v34  ;;  %v1124_v22 = vmul.f32 %v1120_v29, %v2801_v43 }
 0x432   : > { %v1127_v39 = vmul.f32 %v1120_v29, %v3172_v52  ;;  %v1126_v27 = vmul.f32 %v1120_v29, %v3174_v45  ;;  %v2357_v29 = vld [vmem:[#allocation6 + $0x18] ss:$0 sm:$0xff] }
 0x433   : > { %v1137_v50 = vrot.slane %v1123_v41, 3  ;;  %v1138_v42 = vrot.slane %v1125_v24, 3  ;;  %v1134_v61 = vrot.slane %v1122_v23, 3  ;;  %v1135_v59 = vrot.slane %v1124_v22, 3  ;;  %v3210_v41 = vpop.permute.xlu1 %1101 }
 0x434   : > { %v1142_v46 = vrot.slane %v1127_v39, 3  ;;  %v1140_v48 = vrot.slane %v1126_v27, 3  ;;  %3979 = vst [vmem:[#allocation41_spill] sm:$0xff] %v3210_v41 }
 0x435   : > { %v1139_v37 = vsel %vm1058_vm1, %v1137_v50, %v1138_v42  ;;  %v1136_v38 = vsel %vm1058_vm1, %v1134_v61, %v1135_v59 }
 0x436   : > { %1146 = vrot.lane.b32.xlu0 %v1139_v37, %s2602_s4  ;;  %1144 = vrot.lane.b32.xlu1 %v1136_v38, %s2602_s4  ;;  %v1143_v51 = vsel %vm1058_vm1, %v1138_v42, %v1142_v46  ;;  %v1141_v26 = vsel %vm1058_vm1, %v1135_v59, %v1140_v48 }
 0x437   : > { %v3212_v24 = vpop.permute.xlu1 %1105 }
 0x438   : > { %3980 = vst [vmem:[#allocation42_spill] sm:$0xff] %v3212_v24 }
 0x43a   : > { %1150 = vrot.lane.b32.xlu0 %v1143_v51, %s2602_s4  ;;  %1148 = vrot.lane.b32.xlu1 %v1141_v26, %s2602_s4 }
 0x43e   : > { %1164 = vrot.lane.b32.xlu1 %v2357_v29, %s2597_s28 }
 0x4a8   : > { %v3214_v23 = vpop.permute.xlu1 %1144 }
 0x4a9   : > { %3981 = vst [vmem:[#allocation43_spill] sm:$0xff] %v3214_v23 }
 0x4ac   : > { %v3216_v22 = vpop.permute.xlu1 %1148 }
 0x4ad   : > { %3982 = vst [vmem:[#allocation44_spill] sm:$0xff] %v3216_v22 }
 0x4b0   : > { %v1165_v39 = vpop.permute.xlu1 %1164 }
 0x4b1   : > { %v1168_v46 = vmul.f32 %v1165_v39, %v3164_v47  ;;  %v1170_v48 = vmul.f32 %v1165_v39, %v2803_v44  ;;  %v1167_v51 = vmul.f32 %v1165_v39, %v3166_v34  ;;  %v1169_v26 = vmul.f32 %v1165_v39, %v2801_v43 }
 0x4b2   : > { %v1172_v27 = vmul.f32 %v1165_v39, %v3172_v52  ;;  %v1171_v50 = vmul.f32 %v1165_v39, %v3174_v45  ;;  %v2358_v39 = vld [vmem:[#allocation6 + $0x19] ss:$0 sm:$0xff] }
 0x4b3   : > { %v1182_v42 = vrot.slane %v1168_v46, 3  ;;  %v1183_v61 = vrot.slane %v1170_v48, 3  ;;  %v1179_v59 = vrot.slane %v1167_v51, 3  ;;  %v1180_v37 = vrot.slane %v1169_v26, 3  ;;  %v3233_v46 = vpop.permute.xlu0 %1146 }
 0x4b4   : > { %v1187_v22 = vrot.slane %v1172_v27, 3  ;;  %v1185_v24 = vrot.slane %v1171_v50, 3 }
 0x4b5   : > { %v1184_v38 = vsel %vm1058_vm1, %v1182_v42, %v1183_v61  ;;  %v1181_v29 = vsel %vm1058_vm1, %v1179_v59, %v1180_v37 }
 0x4b6   : > { %1191 = vrot.lane.b32.xlu1 %v1184_v38, %s2603_s8  ;;  %1189 = vrot.lane.b32.xlu0 %v1181_v29, %s2603_s8  ;;  %v1188_v23 = vsel %vm1058_vm1, %v1183_v61, %v1187_v22  ;;  %v1186_v41 = vsel %vm1058_vm1, %v1180_v37, %v1185_v24 }
 0x4b7   : > { %v3235_v48 = vpop.permute.xlu0 %1150 }
 0x4b8   : > { %3983 = vst [vmem:[#allocation45_spill] sm:$0xff] %v3235_v48 }
 0x4ba   : > { %1195 = vrot.lane.b32.xlu1 %v1188_v23, %s2603_s8  ;;  %1193 = vrot.lane.b32.xlu0 %v1186_v41, %s2603_s8 }
 0x4be   : > { %1209 = vrot.lane.b32.xlu0 %v2358_v39, %s2599_s17 }
 0x528   : > { %v3237_v51 = vpop.permute.xlu0 %1189 }
 0x52c   : > { %v3239_v26 = vpop.permute.xlu0 %1193 }
 0x52d   : > { %3984 = vst [vmem:[#allocation46_spill] sm:$0xff] %v3239_v26 }
 0x530   : > { %v1210_v27 = vpop.permute.xlu0 %1209 }
 0x531   : > { %v1213_v22 = vmul.f32 %v1210_v27, %v3164_v47  ;;  %v1215_v24 = vmul.f32 %v1210_v27, %v2803_v44  ;;  %v1212_v23 = vmul.f32 %v1210_v27, %v3166_v34  ;;  %v1214_v41 = vmul.f32 %v1210_v27, %v2801_v43 }
 0x532   : > { %v1217_v50 = vmul.f32 %v1210_v27, %v3172_v52  ;;  %v1216_v42 = vmul.f32 %v1210_v27, %v3174_v45  ;;  %v2359_v27 = vld [vmem:[#allocation6 + $0x1a] ss:$0 sm:$0xff] }
 0x533   : > { %v1227_v61 = vrot.slane %v1213_v22, 3  ;;  %v1228_v59 = vrot.slane %v1215_v24, 3  ;;  %v1224_v37 = vrot.slane %v1212_v23, 3  ;;  %v1225_v38 = vrot.slane %v1214_v41, 3  ;;  %v3256_v22 = vpop.permute.xlu1 %1191 }
 0x534   : > { %v1232_v26 = vrot.slane %v1217_v50, 3  ;;  %v1230_v48 = vrot.slane %v1216_v42, 3  ;;  %v3265_v42 = vld [vmem:[#allocation2 + $0x18] sm:$0xff] }
 0x535   : > { %v1229_v29 = vsel %vm1058_vm1, %v1227_v61, %v1228_v59  ;;  %v1226_v39 = vsel %vm1058_vm1, %v1224_v37, %v1225_v38  ;;  %3988 = vst [vmem:[#allocation50_spill] sm:$0xff] %v3265_v42 }
 0x536   : > { %1236 = vrot.lane.b32.xlu0 %v1229_v29, %s2604_s9  ;;  %1234 = vrot.lane.b32.xlu1 %v1226_v39, %s2604_s9  ;;  %v1233_v43 = vsel %vm1058_vm1, %v1228_v59, %v1232_v26  ;;  %v1231_v44 = vsel %vm1058_vm1, %v1225_v38, %v1230_v48  ;;  %v3269_v59 = vld [vmem:[#allocation2 + $0x10] sm:$0xff] }
 0x537   : > { %v3258_v24 = vpop.permute.xlu1 %1195 }
 0x538   : > { %3985 = vst [vmem:[#allocation47_spill] sm:$0xff] %v3258_v24 }
 0x53a   : > { %1240 = vrot.lane.b32.xlu0 %v1233_v43, %s2604_s9  ;;  %1238 = vrot.lane.b32.xlu1 %v1231_v44, %s2604_s9 }
 0x53e   : > { %1254 = vrot.lane.b32.xlu1 %v2359_v27, %s2598_s29 }
 0x5a8   : > { %v3260_v23 = vpop.permute.xlu1 %1234 }
 0x5a9   : > { %3986 = vst [vmem:[#allocation48_spill] sm:$0xff] %v3260_v23 }
 0x5ac   : > { %v3262_v41 = vpop.permute.xlu1 %1238 }
 0x5ad   : > { %3987 = vst [vmem:[#allocation49_spill] sm:$0xff] %v3262_v41 }
 0x5b0   : > { %v1255_v50 = vpop.permute.xlu1 %1254 }
 0x5b1   : > { %v1258_v26 = vmul.f32 %v1255_v50, %v3164_v47  ;;  %v1260_v48 = vmul.f32 %v3265_v42, %v1255_v50  ;;  %v1257_v61 = vmul.f32 %v1255_v50, %v3166_v34  ;;  %v1259_v37 = vmul.f32 %v3269_v59, %v1255_v50 }
 0x5b2   : > { %v1262_v38 = vmul.f32 %v1255_v50, %v3172_v52  ;;  %v1261_v29 = vmul.f32 %v1255_v50, %v3174_v45  ;;  %v2360_v50 = vld [vmem:[#allocation6 + $0x1b] ss:$0 sm:$0xff] }
 0x5b3   : > { %v1272_v39 = vrot.slane %v1258_v26, 3  ;;  %v1273_v43 = vrot.slane %v1260_v48, 3  ;;  %v1269_v44 = vrot.slane %v1257_v61, 3  ;;  %v1270_v27 = vrot.slane %v1259_v37, 3 }
 0x5b4   : > { %v1277_v24 = vrot.slane %v1262_v38, 3  ;;  %v1275_v42 = vrot.slane %v1261_v29, 3  ;;  %v258_v26 = vmul.f32 %v3269_v59, %v2969_v36  ;;  %v384_v36 = vsel %vm382_vm14, %v2994_v8, %v3048_v49  ;;  %v3991_v29 = vld [vmem:[#allocation17_spill] sm:$0xff] }
 0x5b5   : > { %v1274_v47 = vsel %vm1058_vm1, %v1272_v39, %v1273_v43  ;;  %v1271_v41 = vsel %vm1058_vm1, %v1269_v44, %v1270_v27  ;;  %v562_v8 = vsel %vm318_vm12, %v3004_v14, %v3063_v5  ;;  %v652_v14 = vsel %vm382_vm14, %v3012_v17, %v3071_v0  ;;  %v3993_v44 = vld [vmem:[#allocation15_spill] sm:$0xff] }
 0x5b6   : > { %1281 = vrot.lane.b32.xlu1 %v1274_v47, %s2605_s7  ;;  %1279 = vrot.lane.b32.xlu0 %v1271_v41, %s2605_s7  ;;  %v1278_v23 = vsel %vm1058_vm1, %v1273_v43, %v1277_v24  ;;  %v1276_v52 = vsel %vm1058_vm1, %v1270_v27, %v1275_v42  ;;  %v288_v47 = vsel %vm286_vm11, %v3028_v25, %v2988_v3 }
 0x5b7   : > { %v260_v41 = vadd.f32 %v2976_v40, %v258_v26  ;;  %v320_v24 = vsel %vm318_vm12, %v2990_v4, %v3032_v28  ;;  %v416_v3 = vsel %vm414_vm15, %v3054_v53, %v2996_v9  ;;  %v448_v4 = vsel %vm446_vm0, %v2998_v10, %v3057_v56  ;;  %v3994_v26 = vld [vmem:[#allocation14_spill] sm:$0xff] }
 0x5b8   : > { %v518_v9 = vsel %vm286_vm11, %v3061_v57, %v3002_v13  ;;  %v607_v10 = vsel %vm350_vm13, %v3067_v62, %v3008_v15  ;;  %v608_v13 = vsel %vm350_vm13, %v3069_v63, %v3010_v16 }
 0x5b9   : > { %v292_v42 = vadd.f32 %v288_v47, %v260_v41  ;;  %v3995_v47 = vld [vmem:[#allocation18_spill] sm:$0xff]  ;;  %v3996_v41 = vld [vmem:[#allocation23_spill] sm:$0xff] }
 0x5ba   : > { %1285 = vrot.lane.b32.xlu1 %v1278_v23, %s2605_s7  ;;  %1283 = vrot.lane.b32.xlu0 %v1276_v52, %s2605_s7  ;;  %v352_v52 = vsel %vm350_vm13, %v3040_v35, %v2992_v7  ;;  %v517_v7 = vsel %vm286_vm11, %v3059_v55, %v3000_v11  ;;  %v563_v11 = vsel %vm318_vm12, %v3006_v6, %v3065_v58  ;;  %v2347_v55 = vld [vmem:[#allocation6 + $0xe] ss:$0 sm:$0xff] }
 0x5bb   : > { %v324_v23 = vadd.f32 %v320_v24, %v292_v42  ;;  %v521_v35 = vadd.f32 %v517_v7, %v2986_v2  ;;  %v758_v15 = vmul.f32 %v3269_v59, %v2347_v55  ;;  %v653_v6 = vsel %vm382_vm14, %v3014_v18, %v3073_v1  ;;  %v3989_v18 = vld [vmem:[#allocation12_spill] sm:$0xff]  ;;  %v3997_v24 = vld [vmem:[#allocation21_spill] sm:$0xff] }
 0x5bc   : > { %v757_v17 = vmul.f32 %v2347_v55, %v2929_v54  ;;  %v742_v58 = vsel %vm446_vm0, %v3020_v21, %v3079_v32  ;;  %v759_v0 = vmul.f32 %v2347_v55, %v2938_v60  ;;  %v743_v54 = vsel %vm446_vm0, %v3989_v18, %v3081_v33  ;;  %v3990_v32 = vld [vmem:[#allocation13_spill] sm:$0xff]  ;;  %v4006_v55 = vld [vmem:[#allocation28_spill] sm:$0xff]  ;;  %v4013_v18 = vld [vmem:[#allocation34_spill] sm:$0xff] }
 0x5bd   : > { %v356_v48 = vadd.f32 %v352_v52, %v324_v23  ;;  %v566_v53 = vadd.f32 %v562_v8, %v521_v35  ;;  %v765_v63 = vrot.slane %v758_v15, 2  ;;  %v812_v39 = vsel %vm286_vm11, %v3991_v29, %v3990_v32  ;;  %v2354_v8 = vld [vmem:[#allocation6 + $0x15] ss:$0 sm:$0xff]  ;;  %v4002_v35 = vld [vmem:[#allocation24_spill] sm:$0xff]  ;;  %v4008_v15 = vld [vmem:[#allocation37_spill] sm:$0xff] }
 0x5be   : > { %1299 = vrot.lane.b32.xlu0 %v2360_v50, %s2600_s22  ;;  %v764_v37 = vrot.slane %v757_v17, 2  ;;  %v767_v21 = vrot.slane %v759_v0, 2  ;;  %v813_v33 = vsel %vm286_vm11, %v3995_v47, %v3994_v26  ;;  %v902_v42 = vsel %vm350_vm13, %v3997_v24, %v3996_v41  ;;  %v4014_v29 = vld [vmem:[#allocation41_spill] sm:$0xff]  ;;  %v4017_v47 = vld [vmem:[#allocation42_spill] sm:$0xff] }
 0x5bf   : > { %v388_v40 = vadd.f32 %v384_v36, %v356_v48  ;;  %v611_v56 = vadd.f32 %v607_v10, %v566_v53  ;;  %v3998_v36 = vld [vmem:[#allocation20_spill] sm:$0xff]  ;;  %v4005_v53 = vld [vmem:[#allocation29_spill] sm:$0xff]  ;;  %v1054_v0 = vmul.f32 %v2354_v8, %v3174_v45  ;;  %v1197_v24 = vsel %vm350_vm13, %v3237_v51, %v3256_v22 }
 0x5c0   : > { %v766_v38 = vsel %vm763_vm10, %v764_v37, %v765_v63  ;;  %v768_v50 = vsel %vm763_vm10, %v765_v63, %v767_v21  ;;  %v3999_v48 = vld [vmem:[#allocation16_spill] sm:$0xff]  ;;  %v4012_v37 = vld [vmem:[#allocation38_spill] sm:$0xff]  ;;  %v1237_v21 = vpop.permute.xlu0 %1236  ;;  %v4024_v22 = vld [vmem:[#allocation49_spill] sm:$0xff] }
 0x5c1   : > { %v420_v25 = vadd.f32 %v416_v3, %v388_v40  ;;  %v656_v5 = vadd.f32 %v652_v14, %v611_v56  ;;  %v858_v3 = vsel %vm318_vm12, %v3999_v48, %v3998_v36  ;;  %v4000_v40 = vld [vmem:[#allocation27_spill] sm:$0xff]  ;;  %v1053_v14 = vmul.f32 %v3269_v59, %v2354_v8  ;;  %v4019_v36 = vld [vmem:[#allocation45_spill] sm:$0xff]  ;;  %v4020_v48 = vld [vmem:[#allocation44_spill] sm:$0xff] }
 0x5c3   : > { %v452_v28 = vadd.f32 %v448_v4, %v420_v25  ;;  %v4001_v4 = vld [vmem:[#allocation25_spill] sm:$0xff]  ;;  %v1060_v63 = vrot.slane %v1053_v14, 3 }
 0x5c4   : > { %v947_v25 = vsel %vm382_vm14, %v4001_v4, %v4000_v40  ;;  %v4021_v40 = vld [vmem:[#allocation48_spill] sm:$0xff] }
 0x5c5   : > { %v477_v49 = vadd.f32 %v2850_v12, %v452_v28  ;;  %v697_v12 = vsel %vm414_vm15, %v3075_v30, %v3016_v19  ;;  %v698_v19 = vsel %vm414_vm15, %v3077_v31, %v3018_v20  ;;  %v3992_v31 = vld [vmem:[#allocation19_spill] sm:$0xff] }
 0x5c6   : > { %v701_v16 = vadd.f32 %v697_v12, %v656_v5  ;;  %v857_v60 = vsel %vm318_vm12, %v3993_v44, %v3992_v31 }
 0x5c7   : > { %v522_v2 = vadd.f32 %v518_v9, %v477_v49  ;;  %v4003_v9 = vld [vmem:[#allocation22_spill] sm:$0xff]  ;;  %v4004_v49 = vld [vmem:[#allocation31_spill] sm:$0xff] }
 0x5c8   : > { %v746_v61 = vadd.f32 %v742_v58, %v701_v16  ;;  %v903_v10 = vsel %vm350_vm13, %v4003_v9, %v4002_v35  ;;  %v4011_v16 = vld [vmem:[#allocation30_spill] sm:$0xff] }
 0x5c9   : > { %v567_v57 = vadd.f32 %v563_v11, %v522_v2  ;;  %v992_v11 = vsel %vm414_vm15, %v4005_v53, %v4004_v49 }
 0x5ca   : > { %v771_v43 = vadd.f32 %v766_v38, %v746_v61 }
 0x5cb   : > { %v612_v62 = vadd.f32 %v608_v13, %v567_v57  ;;  %v4007_v13 = vld [vmem:[#allocation26_spill] sm:$0xff]  ;;  %v4009_v57 = vld [vmem:[#allocation33_spill] sm:$0xff] }
 0x5cc   : > { %v816_v27 = vadd.f32 %v812_v39, %v771_v43  ;;  %v948_v12 = vsel %vm382_vm14, %v4007_v13, %v4006_v55  ;;  %v1037_v5 = vsel %vm446_vm0, %v4009_v57, %v4008_v15  ;;  %v4015_v39 = vld [vmem:[#allocation39_spill] sm:$0xff] }
 0x5cd   : > { %v657_v30 = vadd.f32 %v653_v6, %v612_v62  ;;  %v1052_v6 = vmul.f32 %v2354_v8, %v3166_v34  ;;  %v4010_v62 = vld [vmem:[#allocation32_spill] sm:$0xff]  ;;  %v1107_v43 = vsel %vm286_vm11, %v4015_v39, %v4014_v29  ;;  %v4025_v57 = vld [vmem:[#allocation35_spill] sm:$0xff] }
 0x5ce   : > { %v861_v23 = vadd.f32 %v857_v60, %v816_v27  ;;  %v4016_v60 = vld [vmem:[#allocation43_spill] sm:$0xff] }
 0x5cf   : > { %v702_v1 = vadd.f32 %v698_v19, %v657_v30  ;;  %v993_v19 = vsel %vm414_vm15, %v4011_v16, %v4010_v62  ;;  %v1152_v27 = vsel %vm318_vm12, %v4016_v60, %v3233_v46  ;;  %v1242_v46 = vsel %vm382_vm14, %v4021_v40, %v1237_v21  ;;  %v4027_v16 = vld [vmem:[#allocation36_spill] sm:$0xff] }
 0x5d0   : > { %v906_v28 = vadd.f32 %v902_v42, %v861_v23  ;;  %v1241_v23 = vpop.permute.xlu0 %1240 }
 0x5d1   : > { %v747_v20 = vadd.f32 %v743_v54, %v702_v1  ;;  %v1038_v54 = vsel %vm446_vm0, %v4013_v18, %v4012_v37  ;;  %v1059_v1 = vrot.slane %v1052_v6, 3  ;;  %v1243_v49 = vsel %vm382_vm14, %v4024_v22, %v1241_v23  ;;  %v4026_v6 = vld [vmem:[#allocation50_spill] sm:$0xff] }
 0x5d2   : > { %v951_v56 = vadd.f32 %v947_v25, %v906_v28  ;;  %v4023_v28 = vld [vmem:[#allocation46_spill] sm:$0xff] }
 0x5d3   : > { %v772_v52 = vadd.f32 %v768_v50, %v747_v20  ;;  %v1061_v32 = vsel %vm1058_vm1, %v1059_v1, %v1060_v63  ;;  %v1062_v20 = vrot.slane %v1054_v0, 3 }
 0x5d4   : > { %v996_v58 = vadd.f32 %v992_v11, %v951_v56 }
 0x5d5   : > { %v817_v7 = vadd.f32 %v813_v33, %v772_v52  ;;  %v1063_v26 = vsel %vm1058_vm1, %v1060_v63, %v1062_v20  ;;  %v4018_v33 = vld [vmem:[#allocation40_spill] sm:$0xff] }
 0x5d6   : > { %v1041_v61 = vadd.f32 %v1037_v5, %v996_v58  ;;  %v1108_v41 = vsel %vm286_vm11, %v4018_v33, %v4017_v47 }
 0x5d7   : > { %v862_v2 = vadd.f32 %v858_v3, %v817_v7  ;;  %v1153_v3 = vsel %vm318_vm12, %v4020_v48, %v4019_v36  ;;  %v4022_v7 = vld [vmem:[#allocation47_spill] sm:$0xff] }
 0x5d8   : > { %v1066_v44 = vadd.f32 %v1061_v32, %v1041_v61  ;;  %v1198_v8 = vsel %vm350_vm13, %v4023_v28, %v4022_v7 }
 0x5d9   : > { %v907_v17 = vadd.f32 %v903_v10, %v862_v2 }
 0x5da   : > { %v1111_v50 = vadd.f32 %v1107_v43, %v1066_v44 }
 0x5db   : > { %v952_v30 = vadd.f32 %v948_v12, %v907_v17 }
 0x5dc   : > { %v1156_v52 = vadd.f32 %v1152_v27, %v1111_v50  ;;  %v3429_v50 = vld [vmem:[#allocation2 + $0x8] sm:$0xf0] }
 0x5dd   : > { %v997_v38 = vadd.f32 %v993_v19, %v952_v30 }
 0x5de   : > { %v1201_v25 = vadd.f32 %v1197_v24, %v1156_v52  ;;  %v3439_v52 = vld [vmem:[#allocation2 + $0x20] sm:$0xf] }
 0x5df   : > { %v1042_v31 = vadd.f32 %v1038_v54, %v997_v38 }
 0x5e0   : > { %v1246_v9 = vadd.f32 %v1242_v46, %v1201_v25 }
 0x5e1   : > { %v1067_v42 = vadd.f32 %v1063_v26, %v1042_v31  ;;  %v3431_v26 = vld [vmem:[#allocation2] sm:$0xf0] }
 0x5e3   : > { %v1112_v4 = vadd.f32 %v1108_v41, %v1067_v42  ;;  %v3437_v42 = vld [vmem:[#allocation2 + $0x28] sm:$0xf] }
 0x5e5   : > { %v1157_v35 = vadd.f32 %v1153_v3, %v1112_v4 }
 0x5e7   : > { %v1202_v11 = vadd.f32 %v1198_v8, %v1157_v35 }
 0x5e9   : > { %v1247_v2 = vadd.f32 %v1243_v49, %v1202_v11 }
 0x628   : > { %v1282_v10 = vpop.permute.xlu1 %1281  ;;  %v1280_v51 = vpop.permute.xlu0 %1279 }
 0x629   : > { %v1287_v53 = vsel %vm414_vm15, %v1280_v51, %v1282_v10  ;;  %v2361_v10 = vld [vmem:[#allocation6 + $0x1c] ss:$0 sm:$0xff] }
 0x62a   : > { %v1291_v14 = vadd.f32 %v1287_v53, %v1246_v9  ;;  %v2363_v9 = vld [vmem:[#allocation6 + $0x1e] ss:$0 sm:$0xff]  ;;  %v1348_v51 = vmul.f32 %v3269_v59, %v2361_v10  ;;  %v1347_v22 = vmul.f32 %v2361_v10, %v3431_v26  ;;  %v1349_v53 = vmul.f32 %v2361_v10, %v3439_v52 }
 0x62c   : > { %v1286_v56 = vpop.permute.xlu1 %1285  ;;  %v1284_v55 = vpop.permute.xlu0 %1283  ;;  %v1355_v49 = vrot.slane %v1348_v51, 4  ;;  %v1354_v11 = vrot.slane %v1347_v22, 4 }
 0x62d   : > { %v1288_v13 = vsel %vm414_vm15, %v1284_v55, %v1286_v56 }
 0x62e   : > { %v1292_v12 = vadd.f32 %v1288_v13, %v1247_v2  ;;  %v1357_v2 = vrot.slane %v1349_v53, 4  ;;  %v2366_v53 = vld [vmem:[#allocation6 + $0x21] ss:$0 sm:$0xff] }
 0x630   : > { %v1300_v15 = vpop.permute.xlu0 %1299 }
 0x631   : > { %v1303_v5 = vmul.f32 %v1300_v15, %v4025_v57  ;;  %v1305_v17 = vmul.f32 %v4026_v6, %v1300_v15  ;;  %v1302_v58 = vmul.f32 %v1300_v15, %v3166_v34  ;;  %v1304_v62 = vmul.f32 %v3269_v59, %v1300_v15 }
 0x632   : > { %v1307_v19 = vmul.f32 %v1300_v15, %v4027_v16  ;;  %v1306_v63 = vmul.f32 %v1300_v15, %v3174_v45  ;;  %v2362_v45 = vld [vmem:[#allocation6 + $0x1d] ss:$0 sm:$0xff]  ;;  %v1358_v57 = vsel %vm1353_vm3, %v1355_v49, %v1357_v2 }
 0x633   : > { %v1317_v0 = vrot.slane %v1303_v5, 3  ;;  %v1318_v30 = vrot.slane %v1305_v17, 3  ;;  %v1314_v61 = vrot.slane %v1302_v58, 3  ;;  %v1315_v37 = vrot.slane %v1304_v62, 3 }
 0x634   : > { %v1322_v1 = vrot.slane %v1307_v19, 3  ;;  %v1320_v38 = vrot.slane %v1306_v63, 3 }
 0x635   : > { %v1319_v18 = vsel %vm1058_vm1, %v1317_v0, %v1318_v30  ;;  %v1316_v54 = vsel %vm1058_vm1, %v1314_v61, %v1315_v37 }
 0x636   : > { %1326 = vrot.lane.b32.xlu0 %v1319_v18, %s2606_s10  ;;  %1324 = vrot.lane.b32.xlu1 %v1316_v54, %s2606_s10  ;;  %v1323_v34 = vsel %vm1058_vm1, %v1318_v30, %v1322_v1  ;;  %v1321_v21 = vsel %vm1058_vm1, %v1315_v37, %v1320_v38 }
 0x63a   : > { %1330 = vrot.lane.b32.xlu0 %v1323_v34, %s2606_s10  ;;  %1328 = vrot.lane.b32.xlu1 %v1321_v21, %s2606_s10 }
 0x63e   : > { %1369 = vrot.lane.b32.xlu1 %v2362_v45, %s2596_s18 }
 0x6a8   : > { %v1327_v32 = vpop.permute.xlu0 %1326  ;;  %v1325_v29 = vpop.permute.xlu1 %1324 }
 0x6a9   : > { %v1332_v39 = vsel %vm446_vm0, %v1325_v29, %v1327_v32 }
 0x6aa   : > { %v1336_v43 = vadd.f32 %v1332_v39, %v1291_v14  ;;  %v1356_v14 = vsel %vm1353_vm3, %v1354_v11, %v1355_v49  ;;  %v2377_v49 = vld [vmem:[#allocation6 + $0x2c] ss:$0 sm:$0xff] }
 0x6ac   : > { %v1331_v20 = vpop.permute.xlu0 %1330  ;;  %v1329_v31 = vpop.permute.xlu1 %1328  ;;  %v1361_v13 = vadd.f32 %v1356_v14, %v1336_v43 }
 0x6ad   : > { %v1333_v44 = vsel %vm446_vm0, %v1329_v31, %v1331_v20  ;;  %v2364_v20 = vld [vmem:[#allocation6 + $0x1f] ss:$0 sm:$0xff]  ;;  %v2365_v31 = vld [vmem:[#allocation6 + $0x20] ss:$0 sm:$0xff] }
 0x6ae   : > { %v1337_v60 = vadd.f32 %v1333_v44, %v1292_v12  ;;  %v2367_v44 = vld [vmem:[#allocation6 + $0x22] ss:$0 sm:$0xff] }
 0x6b0   : > { %v1370_v27 = vpop.permute.xlu1 %1369  ;;  %v1362_v17 = vadd.f32 %v1358_v57, %v1337_v60  ;;  %v2369_v60 = vld [vmem:[#allocation6 + $0x24] ss:$0 sm:$0xff]  ;;  %v2370_v57 = vld [vmem:[#allocation6 + $0x25] ss:$0 sm:$0xff] }
 0x6b1   : > { %v1373_v47 = vmul.f32 %v1370_v27, %v3429_v50  ;;  %v1375_v33 = vmul.f32 %v4026_v6, %v1370_v27  ;;  %v1372_v41 = vmul.f32 %v1370_v27, %v3431_v26  ;;  %v1374_v24 = vmul.f32 %v3269_v59, %v1370_v27 }
 0x6b2   : > { %v1377_v23 = vmul.f32 %v1370_v27, %v3437_v42  ;;  %v1376_v36 = vmul.f32 %v1370_v27, %v3439_v52  ;;  %v2371_v27 = vld [vmem:[#allocation6 + $0x26] ss:$0 sm:$0xff] }
 0x6b3   : > { %v1387_v48 = vrot.slane %v1373_v47, 4  ;;  %v1388_v3 = vrot.slane %v1375_v33, 4  ;;  %v1384_v40 = vrot.slane %v1372_v41, 4  ;;  %v1385_v46 = vrot.slane %v1374_v24, 4  ;;  %v2373_v47 = vld [vmem:[#allocation6 + $0x28] ss:$0 sm:$0xff] }
 0x6b4   : > { %v1392_v7 = vrot.slane %v1377_v23, 4  ;;  %v1390_v28 = vrot.slane %v1376_v36, 4 }
 0x6b5   : > { %v1389_v4 = vsel %vm1353_vm3, %v1387_v48, %v1388_v3  ;;  %v1386_v25 = vsel %vm1353_vm3, %v1384_v40, %v1385_v46 }
 0x6b6   : > { %1396 = vrot.lane.b32.xlu1 %v1389_v4, %s2601_s25  ;;  %1394 = vrot.lane.b32.xlu0 %v1386_v25, %s2601_s25  ;;  %v1393_v8 = vsel %vm1353_vm3, %v1388_v3, %v1392_v7  ;;  %v1391_v35 = vsel %vm1353_vm3, %v1385_v46, %v1390_v28 }
 0x6ba   : > { %1400 = vrot.lane.b32.xlu1 %v1393_v8, %s2601_s25  ;;  %1398 = vrot.lane.b32.xlu0 %v1391_v35, %s2601_s25 }
 0x6be   : > { %1414 = vrot.lane.b32.xlu0 %v2363_v9, %s2595_s20 }
 0x728   : > { %v1397_v56 = vpop.permute.xlu1 %1396  ;;  %v1395_v55 = vpop.permute.xlu0 %1394 }
 0x729   : > { %v1402_v12 = vsel %vm286_vm11, %v1395_v55, %v1397_v56  ;;  %v2379_v56 = vld [vmem:[#allocation6 + $0x2e] ss:$0 sm:$0xff] }
 0x72a   : > { %v1406_v15 = vadd.f32 %v1402_v12, %v1361_v13 }
 0x72c   : > { %v1401_v5 = vpop.permute.xlu1 %1400  ;;  %v1399_v58 = vpop.permute.xlu0 %1398 }
 0x72d   : > { %v1403_v62 = vsel %vm286_vm11, %v1399_v58, %v1401_v5 }
 0x72e   : > { %v1407_v16 = vadd.f32 %v1403_v62, %v1362_v17  ;;  %v2372_v62 = vld [vmem:[#allocation6 + $0x27] ss:$0 sm:$0xff] }
 0x730   : > { %v1415_v19 = vpop.permute.xlu0 %1414 }
 0x731   : > { %v1418_v63 = vmul.f32 %v1415_v19, %v3429_v50  ;;  %v1420_v0 = vmul.f32 %v4026_v6, %v1415_v19  ;;  %v1417_v30 = vmul.f32 %v1415_v19, %v3431_v26  ;;  %v1419_v61 = vmul.f32 %v3269_v59, %v1415_v19 }
 0x732   : > { %v1422_v37 = vmul.f32 %v1415_v19, %v3437_v42  ;;  %v1421_v18 = vmul.f32 %v1415_v19, %v3439_v52 }
 0x733   : > { %v1432_v54 = vrot.slane %v1418_v63, 4  ;;  %v1433_v1 = vrot.slane %v1420_v0, 4  ;;  %v1429_v38 = vrot.slane %v1417_v30, 4  ;;  %v1430_v34 = vrot.slane %v1419_v61, 4  ;;  %v2374_v63 = vld [vmem:[#allocation6 + $0x29] ss:$0 sm:$0xff] }
 0x734   : > { %v1437_v32 = vrot.slane %v1422_v37, 4  ;;  %v1435_v29 = vrot.slane %v1421_v18, 4  ;;  %v2376_v30 = vld [vmem:[#allocation6 + $0x2b] ss:$0 sm:$0xff]  ;;  %v2378_v61 = vld [vmem:[#allocation6 + $0x2d] ss:$0 sm:$0xff] }
 0x735   : > { %v1434_v21 = vsel %vm1353_vm3, %v1432_v54, %v1433_v1  ;;  %v1431_v45 = vsel %vm1353_vm3, %v1429_v38, %v1430_v34  ;;  %v2380_v18 = vld [vmem:[#allocation6 + $0x2f] ss:$0 sm:$0xff] }
 0x736   : > { %1441 = vrot.lane.b32.xlu0 %v1434_v21, %s2602_s4  ;;  %1439 = vrot.lane.b32.xlu1 %v1431_v45, %s2602_s4  ;;  %v1438_v39 = vsel %vm1353_vm3, %v1433_v1, %v1437_v32  ;;  %v1436_v43 = vsel %vm1353_vm3, %v1430_v34, %v1435_v29 }
 0x73a   : > { %1445 = vrot.lane.b32.xlu0 %v1438_v39, %s2602_s4  ;;  %1443 = vrot.lane.b32.xlu1 %v1436_v43, %s2602_s4 }
 0x73e   : > { %1459 = vrot.lane.b32.xlu1 %v2364_v20, %s2597_s28 }
 0x742   : > { %1504 = vrot.lane.b32.xlu1 %v2365_v31, %s2599_s17 }
 0x746   : > { %1594 = vrot.lane.b32.xlu1 %v2367_v44, %s2600_s22 }
 0x74a   : > { %1663 = vrot.lane.b32.xlu1 %v2369_v60, %s2596_s18 }
 0x74e   : > { %1753 = vrot.lane.b32.xlu1 %v2371_v27, %s2597_s28 }
 0x752   : > { %1843 = vrot.lane.b32.xlu1 %v2373_v47, %s2598_s29 }
 0x7a8   : > { %v1442_v33 = vpop.permute.xlu0 %1441  ;;  %v1440_v41 = vpop.permute.xlu1 %1439 }
 0x7a9   : > { %v1447_v24 = vsel %vm318_vm12, %v1440_v41, %v1442_v33 }
 0x7aa   : > { %v3480_v23 = vadd.f32 %v1447_v24, %v1406_v15  ;;  %v2381_v15 = vld [vmem:[#allocation6 + $0x30] ss:$0 sm:$0xff] }
 0x7ac   : > { %v1446_v36 = vpop.permute.xlu0 %1445  ;;  %v1444_v48 = vpop.permute.xlu1 %1443 }
 0x7ad   : > { %v1448_v3 = vsel %vm318_vm12, %v1444_v48, %v1446_v36 }
 0x7ae   : > { %v3483_v40 = vadd.f32 %v1448_v3, %v1407_v16 }
 0x7b0   : > { %v1460_v46 = vpop.permute.xlu1 %1459 }
 0x7b1   : > { %v1464_v4 = vmul.f32 %v3269_v59, %v1460_v46  ;;  %v1466_v25 = vmul.f32 %v1460_v46, %v3439_v52  ;;  %v1462_v7 = vmul.f32 %v1460_v46, %v3431_v26  ;;  %v1463_v51 = vmul.f32 %v1460_v46, %v3429_v50 }
 0x7b2   : > { %v1465_v22 = vmul.f32 %v4026_v6, %v1460_v46  ;;  %v1467_v37 = vmul.f32 %v1460_v46, %v3437_v42 }
 0x7b3   : > { %v1475_v28 = vrot.slane %v1464_v4, 4  ;;  %v1480_v8 = vrot.slane %v1466_v25, 4  ;;  %v1474_v35 = vrot.slane %v1462_v7, 4  ;;  %v1477_v11 = vrot.slane %v1463_v51, 4 }
 0x7b4   : > { %v1478_v14 = vrot.slane %v1465_v22, 4  ;;  %v1505_v2 = vpop.permute.xlu1 %1504  ;;  %v1482_v54 = vrot.slane %v1467_v37, 4 }
 0x7b5   : > { %v1481_v9 = vsel %vm1353_vm3, %v1475_v28, %v1480_v8  ;;  %v1476_v10 = vsel %vm1353_vm3, %v1474_v35, %v1475_v28  ;;  %v1507_v13 = vmul.f32 %v1505_v2, %v3431_v26  ;;  %v1509_v12 = vmul.f32 %v3269_v59, %v1505_v2 }
 0x7b6   : > { %1488 = vrot.lane.b32.xlu1 %v1481_v9, %s2603_s8  ;;  %1484 = vrot.lane.b32.xlu0 %v1476_v10, %s2603_s8  ;;  %v1479_v55 = vsel %vm1353_vm3, %v1477_v11, %v1478_v14  ;;  %v1511_v58 = vmul.f32 %v1505_v2, %v3439_v52  ;;  %v1508_v1 = vmul.f32 %v1505_v2, %v3429_v50 }
 0x7b7   : > { %v1519_v5 = vrot.slane %v1507_v13, 4  ;;  %v1520_v17 = vrot.slane %v1509_v12, 4  ;;  %v1510_v38 = vmul.f32 %v4026_v6, %v1505_v2  ;;  %v1483_v34 = vsel %vm1353_vm3, %v1478_v14, %v1482_v54  ;;  %v3569_v54 = vld [vmem:[#allocation2 + $0x20] sm:$0x1f] }
 0x7b8   : > { %v1525_v19 = vrot.slane %v1511_v58, 4  ;;  %v1522_v21 = vrot.slane %v1508_v1, 4  ;;  %v1512_v32 = vmul.f32 %v1505_v2, %v3437_v42  ;;  %v1595_v20 = vpop.permute.xlu1 %1594  ;;  %v3555_v58 = vld [vmem:[#allocation2] sm:$0xe0] }
 0x7b9   : > { %v1521_v16 = vsel %vm1353_vm3, %v1519_v5, %v1520_v17  ;;  %v1523_v45 = vrot.slane %v1510_v38, 4  ;;  %v1598_v3 = vmul.f32 %v1595_v20, %v3429_v50  ;;  %v1600_v35 = vmul.f32 %v4026_v6, %v1595_v20 }
 0x7ba   : > { %2003 = vrot.lane.b32.xlu1 %v2377_v49, %s2595_s20  ;;  %1549 = vrot.lane.b32.xlu0 %v2366_v53, %s2598_s29  ;;  %v1526_v0 = vsel %vm1353_vm3, %v1520_v17, %v1525_v19  ;;  %v1527_v39 = vrot.slane %v1512_v32, 4  ;;  %v1597_v9 = vmul.f32 %v1595_v20, %v3431_v26  ;;  %v1599_v10 = vmul.f32 %v3269_v59, %v1595_v20 }
 0x7bb   : > { %v1524_v29 = vsel %vm1353_vm3, %v1522_v21, %v1523_v45  ;;  %v1613_v2 = vrot.slane %v1600_v35, 4 }
 0x7bc   : > { %v1528_v43 = vsel %vm1353_vm3, %v1523_v45, %v1527_v39  ;;  %v1664_v31 = vpop.permute.xlu1 %1663 }
 0x7bd   : > { %v1669_v17 = vmul.f32 %v4026_v6, %v1664_v31  ;;  %v1670_v45 = vmul.f32 %v1664_v31, %v3569_v54 }
 0x7be   : > { %2093 = vrot.lane.b32.xlu1 %v2379_v56, %s2599_s17  ;;  %1486 = vrot.lane.b32.xlu0 %v1479_v55, %s2603_s8  ;;  %v1609_v56 = vrot.slane %v1597_v9, 4  ;;  %v1602_v55 = vmul.f32 %v1595_v20, %v3437_v42 }
 0x7bf   : > { %v1682_v37 = vrot.slane %v1669_v17, 5 }
 0x7c0   : > { %v3527_v24 = vpop.permute.xlu1 %1753 }
 0x7c2   : > { %2183 = vrot.lane.b32.xlu1 %v2381_v15, %s2600_s22  ;;  %1708 = vrot.lane.b32.xlu0 %v2370_v57, %s2595_s20  ;;  %v1610_v15 = vrot.slane %v1599_v10, 4  ;;  %v3551_v57 = vld [vmem:[#allocation2 + $0x8] sm:$0xe0]  ;;  %v1759_v10 = vmul.f32 %v4026_v6, %v3527_v24  ;;  %s2388_s20 = sshll.u32 %s2650_s16, 8  ;;  %s2520_s16 = scalar_lea.vmem %s3877_s23, 256 }
 0x7c3   : > { %v1667_v5 = vmul.f32 %v1664_v31, %v3551_v57  ;;  %v1757_v9 = vmul.f32 %v3527_v24, %v3551_v57  ;;  %s3883_s27 = scalar_lea.hbm %s3930_s3, %s2388_s20  ;;  %p2521_p3 = scmp.ne.s32.totalorder %s3877_s23, %s2520_s16 }
 0x7c4   : > { %v3543_v11 = vpop.permute.xlu1 %1843 }
 0x7c5   : > { %p2522_p7 = pnand %p2521_p3, %p4028_p11 }
 0x7c6   : > { %1798 = vrot.lane.b32.xlu0 %v2372_v62, %s2599_s17  ;;  %1529 = vrot.lane.b32.xlu1 %v1521_v16, %s2604_s9  ;;  %v1666_v16 = vmul.f32 %v1664_v31, %v3555_v58  ;;  %s2225_s17 = scalar_lea.sflag [#allocation5], %s2751_s26 }
 0x7c7   : > { %p2523_p9 = pneg %p2522_p7 }
 0x7c8   : > { %v1678_v38 = vrot.slane %v1666_v16, 5 }
 0x7ca   : > { %1888 = vrot.lane.b32.xlu0 %v2374_v63, %s2600_s22  ;;  %1533 = vrot.lane.b32.xlu1 %v1526_v0, %s2604_s9  ;;  %v1611_v63 = vsel %vm1353_vm3, %v1609_v56, %v1610_v15  ;;  %v1617_v0 = vrot.slane %v1602_v55, 4  ;;  %v1771_v55 = vrot.slane %v1757_v9, 5  ;;  %v1850_v9 = vmul.f32 %v3543_v11, %v3569_v54  ;;  %s2607_s22 = smov [#allocation8]  }
 0x7cc   : > { %v1618_v32 = vsel %vm1353_vm3, %v1613_v2, %v1617_v0 }
 0x7ce   : > { %1958 = vrot.lane.b32.xlu0 %v2376_v30, %s2596_s18 }
 0x7d2   : > { %2048 = vrot.lane.b32.xlu0 %v2378_v61, %s2597_s28  ;;  %v1681_v61 = vrot.slane %v1667_v5, 5  ;;  %v1760_v5 = vmul.f32 %v3527_v24, %v3569_v54 }
 0x7d6   : > { %2138 = vrot.lane.b32.xlu0 %v2380_v18, %s2598_s29  ;;  %v3567_v18 = vld [vmem:[#allocation2 + $0x28] sm:$0x1f] }
 0x7d7   : > { %v1671_v21 = vmul.f32 %v1664_v31, %v3567_v18 }
 0x7da   : > { %1490 = vrot.lane.b32.xlu0 %v1483_v34, %s2603_s8 }
 0x7de   : > { %1531 = vrot.lane.b32.xlu0 %v1524_v29, %s2604_s9 }
 0x7e2   : > { %1535 = vrot.lane.b32.xlu0 %v1528_v43, %s2604_s9 }
 0x828   : > { %v1485_v44 = vpop.permute.xlu0 %1484 }
 0x82c   : > { %v1550_v60 = vpop.permute.xlu0 %1549 }
 0x82d   : > { %v1553_v27 = vmul.f32 %v1550_v60, %v3429_v50  ;;  %v1555_v47 = vmul.f32 %v4026_v6, %v1550_v60  ;;  %v1552_v33 = vmul.f32 %v1550_v60, %v3431_v26  ;;  %v1554_v41 = vmul.f32 %v3269_v59, %v1550_v60 }
 0x82e   : > { %v1557_v36 = vmul.f32 %v1550_v60, %v3437_v42  ;;  %v1556_v48 = vmul.f32 %v1550_v60, %v3439_v52  ;;  %v1612_v26 = vrot.slane %v1598_v3, 4  ;;  %v3557_v42 = vpop.permute.xlu1 %1488  ;;  %v1686_v60 = vrot.slane %v1671_v21, 5 }
 0x82f   : > { %v1567_v46 = vrot.slane %v1553_v27, 4  ;;  %v1568_v4 = vrot.slane %v1555_v47, 4  ;;  %v1564_v25 = vrot.slane %v1552_v33, 4  ;;  %v1565_v7 = vrot.slane %v1554_v41, 4 }
 0x830   : > { %v1487_v28 = vpop.permute.xlu0 %1486  ;;  %v1572_v8 = vrot.slane %v1557_v36, 4  ;;  %v1570_v53 = vrot.slane %v1556_v48, 4  ;;  %v1614_v19 = vsel %vm1353_vm3, %v1612_v26, %v1613_v2  ;;  %v1684_v27 = vrot.slane %v1670_v45, 5 }
 0x831   : > { %v1492_v51 = vsel %vm350_vm13, %v1485_v44, %v1487_v28  ;;  %v1569_v22 = vsel %vm1353_vm3, %v1567_v46, %v1568_v4  ;;  %v1566_v49 = vsel %vm1353_vm3, %v1564_v25, %v1565_v7  ;;  %v1687_v3 = vsel %vm216_vm2, %v1682_v37, %v1686_v60 }
 0x832   : > { %v3539_v50 = vadd.f32 %v1492_v51, %v3480_v23  ;;  %1576 = vrot.lane.b32.xlu0 %v1569_v22, %s2605_s7  ;;  %1574 = vrot.lane.b32.xlu1 %v1566_v49, %s2605_s7  ;;  %v1573_v13 = vsel %vm1353_vm3, %v1568_v4, %v1572_v8  ;;  %v1571_v12 = vsel %vm1353_vm3, %v1565_v7, %v1570_v53  ;;  %v3577_v39 = vpop.permute.xlu1 %2003 }
 0x833   : > { %v1601_v23 = vmul.f32 %v1595_v20, %v3439_v52  ;;  %v1668_v52 = vmul.f32 %v3269_v59, %v1664_v31  ;;  %v1683_v20 = vsel %vm216_vm2, %v1681_v61, %v1682_v37  ;;  %v1756_v22 = vmul.f32 %v3527_v24, %v3555_v58 }
 0x834   : > { %v1709_v14 = vpop.permute.xlu0 %1708  ;;  %v1758_v49 = vmul.f32 %v3269_v59, %v3527_v24  ;;  %v1774_v37 = vrot.slane %v1760_v5, 5 }
 0x835   : > { %v1615_v30 = vrot.slane %v1601_v23, 4  ;;  %v1679_v34 = vrot.slane %v1668_v52, 5  ;;  %v1712_v31 = vmul.f32 %v1709_v14, %v3551_v57  ;;  %v1714_v47 = vmul.f32 %v4026_v6, %v1709_v14 }
 0x836   : > { %1580 = vrot.lane.b32.xlu0 %v1573_v13, %s2605_s7  ;;  %1578 = vrot.lane.b32.xlu1 %v1571_v12, %s2605_s7  ;;  %v1711_v33 = vmul.f32 %v1709_v14, %v3555_v58  ;;  %v1713_v41 = vmul.f32 %v3269_v59, %v1709_v14  ;;  %v3591_v36 = vpop.permute.xlu1 %2093  ;;  %v1716_v4 = vmul.f32 %v1709_v14, %v3567_v18  ;;  %v1772_v13 = vrot.slane %v1759_v10, 5 }
 0x837   : > { %v1616_v29 = vsel %vm1353_vm3, %v1610_v15, %v1615_v30  ;;  %v1680_v44 = vsel %vm216_vm2, %v1678_v38, %v1679_v34  ;;  %v1685_v46 = vsel %vm216_vm2, %v1679_v34, %v1684_v27  ;;  %v1715_v25 = vmul.f32 %v1709_v14, %v3569_v54 }
 0x838   : > { %v3559_v62 = vpop.permute.xlu0 %1798  ;;  %v1726_v7 = vrot.slane %v1712_v31, 5  ;;  %v1727_v28 = vrot.slane %v1714_v47, 5  ;;  %v1723_v8 = vrot.slane %v1711_v33, 5  ;;  %v1724_v35 = vrot.slane %v1713_v41, 5 }
 0x839   : > { %v1731_v26 = vrot.slane %v1716_v4, 5  ;;  %v1729_v2 = vrot.slane %v1715_v25, 5  ;;  %v1768_v15 = vrot.slane %v1756_v22, 5  ;;  %v1761_v23 = vmul.f32 %v3527_v24, %v3567_v18 }
 0x83a   : > { %1621 = vrot.lane.b32.xlu0 %v1614_v19, %s2606_s10  ;;  %1619 = vrot.lane.b32.xlu1 %v1611_v63, %s2606_s10  ;;  %v1728_v53 = vsel %vm216_vm2, %v1726_v7, %v1727_v28  ;;  %v1725_v14 = vsel %vm216_vm2, %v1723_v8, %v1724_v35  ;;  %v3613_v56 = vpop.permute.xlu1 %2183  ;;  %v1769_v19 = vrot.slane %v1758_v49, 5  ;;  %v1773_v0 = vsel %vm216_vm2, %v1771_v55, %v1772_v13 }
 0x83b   : > { %v1732_v16 = vsel %vm216_vm2, %v1727_v28, %v1731_v26  ;;  %v1730_v52 = vsel %vm216_vm2, %v1724_v35, %v1729_v2  ;;  %v1776_v24 = vrot.slane %v1761_v23, 5  ;;  %v1804_v38 = vmul.f32 %v4026_v6, %v3559_v62 }
 0x83c   : > { %v3571_v1 = vpop.permute.xlu0 %1888  ;;  %v1801_v21 = vmul.f32 %v3559_v62, %v3555_v58  ;;  %v1803_v45 = vmul.f32 %v3269_v59, %v3559_v62  ;;  %v1806_v47 = vmul.f32 %v3559_v62, %v3567_v18  ;;  %v1805_v33 = vmul.f32 %v3559_v62, %v3569_v54 }
 0x83d   : > { %v1817_v60 = vrot.slane %v1804_v38, 5  ;;  %v1849_v41 = vmul.f32 %v4026_v6, %v3543_v11  ;;  %v1851_v35 = vmul.f32 %v3543_v11, %v3567_v18  ;;  %v1864_v2 = vrot.slane %v1850_v9, 5 }
 0x83e   : > { %1625 = vrot.lane.b32.xlu0 %v1618_v32, %s2606_s10  ;;  %1623 = vrot.lane.b32.xlu1 %v1616_v29, %s2606_s10  ;;  %v1530_v30 = vpop.permute.xlu1 %1529  ;;  %v1777_v29 = vsel %vm216_vm2, %v1772_v13, %v1776_v24  ;;  %v1813_v27 = vrot.slane %v1801_v21, 5  ;;  %v1814_v31 = vrot.slane %v1803_v45, 5  ;;  %v1821_v25 = vrot.slane %v1806_v47, 5  ;;  %v3710_v21 = vld [vmem:[#allocation2 + $0x28] sm:$0x3f] }
 0x83f   : > { %v1819_v7 = vrot.slane %v1805_v33, 5  ;;  %v1862_v8 = vrot.slane %v1849_v41, 5  ;;  %v1866_v26 = vrot.slane %v1851_v35, 5  ;;  %v1892_v55 = vmul.f32 %v3571_v1, %v3551_v57  ;;  %v3724_v33 = vld [vmem:[#allocation2 + $0x18] sm:$0xff] }
 0x840   : > { %v3581_v43 = vpop.permute.xlu0 %1958  ;;  %v1822_v10 = vsel %vm216_vm2, %v1817_v60, %v1821_v25 }
 0x841   : > { %v1820_v22 = vsel %vm216_vm2, %v1814_v31, %v1819_v7  ;;  %v1867_v23 = vsel %vm216_vm2, %v1862_v8, %v1866_v26 }
 0x842   : > { %1690 = vrot.lane.b32.xlu0 %v1683_v20, %s2601_s25  ;;  %1688 = vrot.lane.b32.xlu1 %v1680_v44, %s2601_s25  ;;  %v1775_v20 = vsel %vm216_vm2, %v1769_v19, %v1774_v37 }
 0x844   : > { %v3593_v48 = vpop.permute.xlu0 %2048 }
 0x846   : > { %1694 = vrot.lane.b32.xlu0 %v1687_v3, %s2601_s25  ;;  %1692 = vrot.lane.b32.xlu1 %v1685_v46, %s2601_s25  ;;  %v1846_v3 = vmul.f32 %v3543_v11, %v3555_v58  ;;  %v1848_v46 = vmul.f32 %v3269_v59, %v3543_v11 }
 0x848   : > { %v3605_v51 = vpop.permute.xlu0 %2138  ;;  %v1858_v49 = vrot.slane %v1846_v3, 5  ;;  %v3730_v3 = vld [vmem:[#allocation2 + $0x10] sm:$0xff] }
 0x84a   : > { %1735 = vrot.lane.b32.xlu0 %v1728_v53, %s2602_s4  ;;  %1733 = vrot.lane.b32.xlu1 %v1725_v14, %s2602_s4  ;;  %v1859_v53 = vrot.slane %v1848_v46, 5 }
 0x84c   : > { %v1491_v12 = vpop.permute.xlu0 %1490  ;;  %v1860_v13 = vsel %vm216_vm2, %v1858_v49, %v1859_v53  ;;  %v1865_v5 = vsel %vm216_vm2, %v1859_v53, %v1864_v2  ;;  %v2054_v2 = vmul.f32 %v3724_v33, %v3593_v48 }
 0x84d   : > { %v1493_v17 = vsel %vm350_vm13, %v3557_v42, %v1491_v12  ;;  %v1802_v42 = vmul.f32 %v3559_v62, %v3551_v57  ;;  %v1815_v62 = vsel %vm216_vm2, %v1813_v27, %v1814_v31  ;;  %v1891_v12 = vmul.f32 %v3571_v1, %v3555_v58 }
 0x84e   : > { %v3626_v63 = vadd.f32 %v1493_v17, %v3483_v40  ;;  %1739 = vrot.lane.b32.xlu0 %v1732_v16, %s2602_s4  ;;  %1737 = vrot.lane.b32.xlu1 %v1730_v52, %s2602_s4  ;;  %v1770_v40 = vsel %vm216_vm2, %v1768_v15, %v1769_v19  ;;  %v1893_v15 = vmul.f32 %v3269_v59, %v3571_v1 }
 0x84f   : > { %v1816_v44 = vrot.slane %v1802_v42, 5  ;;  %v1896_v17 = vmul.f32 %v3571_v1, %v3567_v18  ;;  %v1903_v52 = vrot.slane %v1891_v12, 5  ;;  %v1964_v18 = vmul.f32 %v4026_v6, %v3581_v43 }
 0x850   : > { %v1532_v61 = vpop.permute.xlu0 %1531  ;;  %v1904_v19 = vrot.slane %v1893_v15, 5  ;;  %v1966_v31 = vmul.f32 %v3581_v43, %v3710_v21 }
 0x851   : > { %v1537_v34 = vsel %vm382_vm14, %v1530_v30, %v1532_v61  ;;  %v1818_v4 = vsel %vm216_vm2, %v1816_v44, %v1817_v60  ;;  %v3694_v30 = vld [vmem:[#allocation2 + $0x8] sm:$0xc0]  ;;  %v3696_v61 = vld [vmem:[#allocation2] sm:$0xc0]  ;;  %v1911_v24 = vrot.slane %v1896_v17, 5 }
 0x852   : > { %v3642_v32 = vadd.f32 %v1537_v34, %v3539_v50  ;;  %1780 = vrot.lane.b32.xlu0 %v1773_v0, %s2603_s8  ;;  %1778 = vrot.lane.b32.xlu1 %v1770_v40, %s2603_s8  ;;  %v1847_v50 = vmul.f32 %v3543_v11, %v3551_v57  ;;  %v1894_v11 = vmul.f32 %v4026_v6, %v3571_v1  ;;  %v1906_v57 = vrot.slane %v1892_v55, 5  ;;  %v3713_v44 = vld [vmem:[#allocation2 + $0x20] sm:$0x3f] }
 0x853   : > { %v1895_v0 = vmul.f32 %v3571_v1, %v3569_v54  ;;  %v1962_v37 = vmul.f32 %v3581_v43, %v3694_v30  ;;  %v1961_v42 = vmul.f32 %v3581_v43, %v3696_v61  ;;  %v1905_v38 = vsel %vm216_vm2, %v1903_v52, %v1904_v19 }
 0x854   : > { %v1861_v28 = vrot.slane %v1847_v50, 5  ;;  %v1907_v16 = vrot.slane %v1894_v11, 5  ;;  %v1963_v40 = vmul.f32 %v3269_v59, %v3581_v43  ;;  %v1965_v59 = vmul.f32 %v3581_v43, %v3713_v44 }
 0x855   : > { %v1909_v34 = vrot.slane %v1895_v0, 5  ;;  %v1976_v6 = vrot.slane %v1962_v37, 6  ;;  %v2007_v47 = vmul.f32 %v3577_v39, %v3694_v30  ;;  %v2009_v50 = vmul.f32 %v3724_v33, %v3577_v39 }
 0x856   : > { %1784 = vrot.lane.b32.xlu0 %v1777_v29, %s2603_s8  ;;  %1782 = vrot.lane.b32.xlu1 %v1775_v20, %s2603_s8  ;;  %v1863_v14 = vsel %vm216_vm2, %v1861_v28, %v1862_v8  ;;  %v1908_v1 = vsel %vm216_vm2, %v1906_v57, %v1907_v16  ;;  %v1912_v45 = vsel %vm216_vm2, %v1907_v16, %v1911_v24  ;;  %v1977_v29 = vrot.slane %v1964_v18, 6 }
 0x857   : > { %v1973_v20 = vrot.slane %v1961_v42, 6  ;;  %v1910_v60 = vsel %vm216_vm2, %v1904_v19, %v1909_v34  ;;  %v1974_v27 = vrot.slane %v1963_v40, 6  ;;  %v2006_v41 = vmul.f32 %v3577_v39, %v3696_v61 }
 0x858   : > { %v2008_v43 = vmul.f32 %v3730_v3, %v3577_v39  ;;  %v1978_v46 = vsel %vm1942_vm4, %v1976_v6, %v1977_v29  ;;  %v1979_v25 = vrot.slane %v1965_v59, 6  ;;  %v2021_v7 = vrot.slane %v2007_v47, 6 }
 0x859   : > { %v2022_v28 = vrot.slane %v2009_v50, 6  ;;  %v2011_v8 = vmul.f32 %v3577_v39, %v3710_v21  ;;  %v2010_v35 = vmul.f32 %v3577_v39, %v3713_v44  ;;  %v2052_v26 = vmul.f32 %v3593_v48, %v3694_v30 }
 0x85a   : > { %1825 = vrot.lane.b32.xlu0 %v1818_v4, %s2604_s9  ;;  %1823 = vrot.lane.b32.xlu1 %v1815_v62, %s2604_s9  ;;  %v1975_v4 = vsel %vm1942_vm4, %v1973_v20, %v1974_v27  ;;  %v1981_v62 = vrot.slane %v1966_v31, 6  ;;  %v2019_v49 = vrot.slane %v2008_v43, 6  ;;  %v2053_v11 = vmul.f32 %v3730_v3, %v3593_v48 }
 0x85b   : > { %v2026_v53 = vrot.slane %v2011_v8, 6  ;;  %v2023_v39 = vsel %vm1942_vm4, %v2021_v7, %v2022_v28  ;;  %v2056_v16 = vmul.f32 %v3593_v48, %v3710_v21  ;;  %v2055_v52 = vmul.f32 %v3593_v48, %v3713_v44 }
 0x85c   : > { %v1982_v9 = vsel %vm1942_vm4, %v1977_v29, %v1981_v62  ;;  %v2064_v17 = vrot.slane %v2053_v11, 6  ;;  %v2097_v0 = vmul.f32 %v3591_v36, %v3694_v30  ;;  %v2099_v24 = vmul.f32 %v3724_v33, %v3591_v36 }
 0x85d   : > { %v2027_v12 = vsel %vm1942_vm4, %v2022_v28, %v2026_v53  ;;  %v2096_v37 = vmul.f32 %v3591_v36, %v3696_v61  ;;  %v2071_v42 = vrot.slane %v2056_v16, 6  ;;  %v2101_v40 = vmul.f32 %v3591_v36, %v3710_v21  ;;  %v1536_v16 = vpop.permute.xlu0 %1535 }
 0x85e   : > { %1829 = vrot.lane.b32.xlu0 %v1822_v10, %s2604_s9  ;;  %1827 = vrot.lane.b32.xlu1 %v1820_v22, %s2604_s9  ;;  %v1980_v10 = vsel %vm1942_vm4, %v1974_v27, %v1979_v25  ;;  %v2018_v22 = vrot.slane %v2006_v41, 6  ;;  %v2112_v34 = vrot.slane %v2099_v24, 6  ;;  %v2142_v47 = vmul.f32 %v3605_v51, %v3694_v30 }
 0x85f   : > { %v2108_v20 = vrot.slane %v2096_v37, 6  ;;  %v2116_v31 = vrot.slane %v2101_v40, 6  ;;  %v2141_v41 = vmul.f32 %v3605_v51, %v3696_v61  ;;  %v2143_v43 = vmul.f32 %v3730_v3, %v3605_v51 }
 0x860   : > { %v2020_v55 = vsel %vm1942_vm4, %v2018_v22, %v2019_v49  ;;  %v2156_v62 = vrot.slane %v2142_v47, 6  ;;  %v2146_v25 = vmul.f32 %v3605_v51, %v3710_v21  ;;  %v2189_v22 = vmul.f32 %v3724_v33, %v3613_v56 }
 0x861   : > { %v2153_v28 = vrot.slane %v2141_v41, 6  ;;  %v2154_v8 = vrot.slane %v2143_v43, 6  ;;  %v2191_v11 = vmul.f32 %v3613_v56, %v3710_v21 }
 0x862   : > { %1870 = vrot.lane.b32.xlu0 %v1863_v14, %s2605_s7  ;;  %1868 = vrot.lane.b32.xlu1 %v1860_v13, %s2605_s7  ;;  %v2024_v14 = vrot.slane %v2010_v35, 6  ;;  %v2051_v13 = vmul.f32 %v3593_v48, %v3696_v61  ;;  %v2098_v48 = vmul.f32 %v3730_v3, %v3591_v36  ;;  %v2145_v35 = vmul.f32 %v3605_v51, %v3713_v44 }
 0x864   : > { %v2025_v15 = vsel %vm1942_vm4, %v2019_v49, %v2024_v14  ;;  %v2063_v57 = vrot.slane %v2051_v13, 6  ;;  %v2186_v49 = vmul.f32 %v3613_v56, %v3696_v61  ;;  %v2155_v14 = vsel %vm1942_vm4, %v2153_v28, %v2154_v8 }
 0x866   : > { %1874 = vrot.lane.b32.xlu0 %v1867_v23, %s2605_s7  ;;  %1872 = vrot.lane.b32.xlu1 %v1865_v5, %s2605_s7  ;;  %v2066_v23 = vrot.slane %v2052_v26, 6  ;;  %v2067_v5 = vrot.slane %v2054_v2, 6  ;;  %v2065_v18 = vsel %vm1942_vm4, %v2063_v57, %v2064_v17  ;;  %v2159_v26 = vrot.slane %v2145_v35, 6 }
 0x868   : > { %v2068_v19 = vsel %vm1942_vm4, %v2066_v23, %v2067_v5  ;;  %v2072_v6 = vsel %vm1942_vm4, %v2067_v5, %v2071_v42  ;;  %v2206_v5 = vrot.slane %v2191_v11, 6 }
 0x86a   : > { %1915 = vrot.lane.b32.xlu0 %v1908_v1, %s2606_s10  ;;  %1913 = vrot.lane.b32.xlu1 %v1905_v38, %s2606_s10  ;;  %v2069_v1 = vrot.slane %v2055_v52, 6  ;;  %v2111_v38 = vrot.slane %v2097_v0, 6 }
 0x86c   : > { %v2070_v29 = vsel %vm1942_vm4, %v2064_v17, %v2069_v1  ;;  %v2113_v27 = vsel %vm1942_vm4, %v2111_v38, %v2112_v34 }
 0x86e   : > { %1919 = vrot.lane.b32.xlu0 %v1912_v45, %s2606_s10  ;;  %1917 = vrot.lane.b32.xlu1 %v1910_v60, %s2606_s10  ;;  %v2100_v45 = vmul.f32 %v3591_v36, %v3713_v44  ;;  %v2109_v60 = vrot.slane %v2098_v48, 6  ;;  %v2144_v36 = vmul.f32 %v3724_v33, %v3605_v51  ;;  %v2188_v51 = vmul.f32 %v3730_v3, %v3613_v56 }
 0x86f   : > { %v2198_v33 = vrot.slane %v2186_v49, 6 }
 0x870   : > { %v2114_v59 = vrot.slane %v2100_v45, 6  ;;  %v2110_v50 = vsel %vm1942_vm4, %v2108_v20, %v2109_v60  ;;  %v2157_v7 = vrot.slane %v2144_v36, 6  ;;  %v2199_v13 = vrot.slane %v2188_v51, 6 }
 0x872   : > { %1985 = vrot.lane.b32.xlu0 %v1978_v46, %s2601_s25  ;;  %1983 = vrot.lane.b32.xlu1 %v1975_v4, %s2601_s25  ;;  %v2117_v46 = vsel %vm1942_vm4, %v2112_v34, %v2116_v31  ;;  %v2115_v4 = vsel %vm1942_vm4, %v2109_v60, %v2114_v59  ;;  %v2158_v53 = vsel %vm1942_vm4, %v2156_v62, %v2157_v7  ;;  %v2368_v34 = vld [vmem:[#allocation6 + $0x23] ss:$0 sm:$0xff] }
 0x873   : > { %v2200_v23 = vsel %vm1942_vm4, %v2198_v33, %v2199_v13  ;;  %v1643_v40 = vmul.f32 %v3730_v3, %v2368_v34  ;;  %v1642_v20 = vmul.f32 %v2368_v34, %v3555_v58 }
 0x875   : > { %v1648_v47 = vrot.slane %v1642_v20, 5 }
 0x876   : > { %1989 = vrot.lane.b32.xlu0 %v1982_v9, %s2601_s25  ;;  %1987 = vrot.lane.b32.xlu1 %v1980_v10, %s2601_s25  ;;  %v2161_v9 = vrot.slane %v2146_v25, 6  ;;  %v2187_v10 = vmul.f32 %v3613_v56, %v3694_v30  ;;  %s2524_s25 = sshll.u32 %s2607_s22, 4  ;;  %s2525_s25 = int_to_ptr.vmem [resolvable:$false] %s2524_s25 }
 0x877   : > { %p2527_p10 = scmp.lt.s32.totalorder %s3877_s23, %s2525_s25 }
 0x878   : > { %v2162_v30 = vsel %vm1942_vm4, %v2157_v7, %v2161_v9  ;;  %v2201_v2 = vrot.slane %v2187_v10, 6 }
 0x87a   : > { %2030 = vrot.lane.b32.xlu0 %v2023_v39, %s2602_s4  ;;  %2028 = vrot.lane.b32.xlu1 %v2020_v55, %s2602_s4  ;;  %v2202_v39 = vrot.slane %v2189_v22, 6  ;;  %v2160_v55 = vsel %vm1942_vm4, %v2154_v8, %v2159_v26 }
 0x87c   : > { %v2207_v17 = vsel %vm1942_vm4, %v2202_v39, %v2206_v5 }
 0x87e   : > { %2034 = vrot.lane.b32.xlu0 %v2027_v12, %s2602_s4  ;;  %2032 = vrot.lane.b32.xlu1 %v2025_v15, %s2602_s4  ;;  %v2190_v12 = vmul.f32 %v3613_v56, %v3713_v44  ;;  %v2203_v15 = vsel %vm1942_vm4, %v2201_v2, %v2202_v39  ;;  %v1534_v56 = vpop.permute.xlu1 %1533  ;;  %s2526_s4 = scalar_lea.vmem %s2525_s25, 512 }
 0x87f   : > { %v1538_v0 = vsel %vm382_vm14, %v1534_v56, %v1536_v16  ;;  %p2528_p12 = scmp.lt.s32.totalorder %s2526_s4, %s2520_s16 }
 0x880   : > { %v2204_v57 = vrot.slane %v2190_v12, 6 }
 0x881   : > { %p2529_p13 = por %p2528_p12, %p2527_p10 }
 0x882   : > { %2075 = vrot.lane.b32.xlu0 %v2068_v19, %s2603_s8  ;;  %2073 = vrot.lane.b32.xlu1 %v2065_v18, %s2603_s8  ;;  %v2205_v21 = vsel %vm1942_vm4, %v2199_v13, %v2204_v57  ;;  %v1542_v18 = vadd.f32 %v1538_v0, %v3626_v63 }
 0x883   : > { %p2530_p0 = pnand %p2529_p13, %p2523_p9 }
 0x886   : > { %2079 = vrot.lane.b32.xlu0 %v2072_v6, %s2603_s8  ;;  %2077 = vrot.lane.b32.xlu1 %v2070_v29, %s2603_s8 }
 0x88a   : > { %2120 = vrot.lane.b32.xlu0 %v2113_v27, %s2604_s9  ;;  %2118 = vrot.lane.b32.xlu1 %v2110_v50, %s2604_s9  ;;  %v1649_v27 = vrot.slane %v1643_v40, 5 }
 0x88c   : > { %v1650_v36 = vsel %vm216_vm2, %v1648_v47, %v1649_v27 }
 0x88e   : > { %2124 = vrot.lane.b32.xlu0 %v2117_v46, %s2604_s9  ;;  %2122 = vrot.lane.b32.xlu1 %v2115_v4, %s2604_s9 }
 0x892   : > { %2165 = vrot.lane.b32.xlu0 %v2158_v53, %s2605_s7  ;;  %2163 = vrot.lane.b32.xlu1 %v2155_v14, %s2605_s7 }
 0x896   : > { %2169 = vrot.lane.b32.xlu0 %v2162_v30, %s2605_s7  ;;  %2167 = vrot.lane.b32.xlu1 %v2160_v55, %s2605_s7 }
 0x89a   : > { %2210 = vrot.lane.b32.xlu0 %v2203_v15, %s2606_s10  ;;  %2208 = vrot.lane.b32.xlu1 %v2200_v23, %s2606_s10 }
 0x89e   : > { %2214 = vrot.lane.b32.xlu0 %v2207_v17, %s2606_s10  ;;  %2212 = vrot.lane.b32.xlu1 %v2205_v21, %s2606_s10 }
 0x8a4   : > { %v1577_v52 = vpop.permute.xlu0 %1576  ;;  %v1575_v19 = vpop.permute.xlu1 %1574 }
 0x8a5   : > { %v1582_v24 = vsel %vm414_vm15, %v1575_v19, %v1577_v52 }
 0x8a6   : > { %v1586_v37 = vadd.f32 %v1582_v24, %v3642_v32  ;;  %v1644_v32 = vmul.f32 %v2368_v34, %v3569_v54 }
 0x8a8   : > { %v1581_v42 = vpop.permute.xlu0 %1580  ;;  %v1579_v1 = vpop.permute.xlu1 %1578  ;;  %v1651_v41 = vrot.slane %v1644_v32, 5 }
 0x8a9   : > { %v1583_v48 = vsel %vm414_vm15, %v1579_v1, %v1581_v42 }
 0x8aa   : > { %v1587_v38 = vadd.f32 %v1583_v48, %v1542_v18  ;;  %v1652_v58 = vsel %vm216_vm2, %v1649_v27, %v1651_v41 }
 0x8ac   : > { %v1622_v45 = vpop.permute.xlu0 %1621  ;;  %v1620_v6 = vpop.permute.xlu1 %1619 }
 0x8ad   : > { %v1627_v29 = vsel %vm446_vm0, %v1620_v6, %v1622_v45  ;;  %v2375_v45 = vld [vmem:[#allocation6 + $0x2a] ss:$0 sm:$0xff] }
 0x8ae   : > { %v1631_v60 = vadd.f32 %v1627_v29, %v1586_v37  ;;  %v1937_v27 = vmul.f32 %v3730_v3, %v2375_v45  ;;  %v1936_v47 = vmul.f32 %v2375_v45, %v3696_v61 }
 0x8b0   : > { %v1626_v31 = vpop.permute.xlu0 %1625  ;;  %v1624_v63 = vpop.permute.xlu1 %1623  ;;  %v1655_v4 = vadd.f32 %v1650_v36, %v1631_v60 }
 0x8b1   : > { %v1628_v59 = vsel %vm446_vm0, %v1624_v63, %v1626_v31 }
 0x8b2   : > { %v1632_v50 = vadd.f32 %v1628_v59, %v1587_v38 }
 0x8b4   : > { %v1691_v43 = vpop.permute.xlu0 %1690  ;;  %v1689_v46 = vpop.permute.xlu1 %1688  ;;  %v1656_v28 = vadd.f32 %v1652_v58, %v1632_v50 }
 0x8b5   : > { %v1696_v62 = vsel %vm286_vm11, %v1689_v46, %v1691_v43 }
 0x8b6   : > { %v1700_v25 = vadd.f32 %v1696_v62, %v1655_v4  ;;  %v1944_v4 = vrot.slane %v1937_v27, 6  ;;  %v1938_v62 = vmul.f32 %v2375_v45, %v3713_v44 }
 0x8b8   : > { %v1695_v7 = vpop.permute.xlu0 %1694  ;;  %v1693_v54 = vpop.permute.xlu1 %1692 }
 0x8b9   : > { %v1697_v8 = vsel %vm286_vm11, %v1693_v54, %v1695_v7  ;;  %v1943_v7 = vrot.slane %v1936_v47, 6 }
 0x8ba   : > { %v1701_v35 = vadd.f32 %v1697_v8, %v1656_v28 }
 0x8bc   : > { %v1736_v9 = vpop.permute.xlu0 %1735  ;;  %v1734_v10 = vpop.permute.xlu1 %1733 }
 0x8bd   : > { %v1741_v37 = vsel %vm318_vm12, %v1734_v10, %v1736_v9  ;;  %v1946_v9 = vrot.slane %v1938_v62, 6 }
 0x8be   : > { %v1745_v48 = vadd.f32 %v1741_v37, %v1700_v25 }
 0x8c0   : > { %v1740_v22 = vpop.permute.xlu0 %1739  ;;  %v1738_v49 = vpop.permute.xlu1 %1737 }
 0x8c1   : > { %v1742_v38 = vsel %vm318_vm12, %v1738_v49, %v1740_v22 }
 0x8c2   : > { %v1746_v32 = vadd.f32 %v1742_v38, %v1701_v35  ;;  %v1945_v35 = vsel %vm1942_vm4, %v1943_v7, %v1944_v4 }
 0x8c4   : > { %v1781_v53 = vpop.permute.xlu0 %1780  ;;  %v1779_v14 = vpop.permute.xlu1 %1778 }
 0x8c5   : > { %v1786_v1 = vsel %vm350_vm13, %v1779_v14, %v1781_v53 }
 0x8c6   : > { %v1790_v40 = vadd.f32 %v1786_v1, %v1745_v48 }
 0x8c8   : > { %v1785_v26 = vpop.permute.xlu0 %1784  ;;  %v1783_v51 = vpop.permute.xlu1 %1782 }
 0x8c9   : > { %v1787_v20 = vsel %vm350_vm13, %v1783_v51, %v1785_v26  ;;  %v1947_v26 = vsel %vm1942_vm4, %v1944_v4, %v1946_v9 }
 0x8ca   : > { %v1791_v50 = vadd.f32 %v1787_v20, %v1746_v32 }
 0x8cc   : > { %v1826_v30 = vpop.permute.xlu0 %1825  ;;  %v1824_v2 = vpop.permute.xlu1 %1823 }
 0x8cd   : > { %v1831_v34 = vsel %vm382_vm14, %v1824_v2, %v1826_v30 }
 0x8ce   : > { %v1835_v31 = vadd.f32 %v1831_v34, %v1790_v40 }
 0x8d0   : > { %v1830_v39 = vpop.permute.xlu0 %1829  ;;  %v1828_v33 = vpop.permute.xlu1 %1827 }
 0x8d1   : > { %v1832_v63 = vsel %vm382_vm14, %v1828_v33, %v1830_v39 }
 0x8d2   : > { %v1836_v25 = vadd.f32 %v1832_v63, %v1791_v50 }
 0x8d4   : > { %v1871_v55 = vpop.permute.xlu0 %1870  ;;  %v1869_v13 = vpop.permute.xlu1 %1868 }
 0x8d5   : > { %v1876_v60 = vsel %vm414_vm15, %v1869_v13, %v1871_v55 }
 0x8d6   : > { %v1880_v36 = vadd.f32 %v1876_v60, %v1835_v31 }
 0x8d8   : > { %v1875_v11 = vpop.permute.xlu0 %1874  ;;  %v1873_v12 = vpop.permute.xlu1 %1872 }
 0x8d9   : > { %v1877_v46 = vsel %vm414_vm15, %v1873_v12, %v1875_v11 }
 0x8da   : > { %v1881_v28 = vadd.f32 %v1877_v46, %v1836_v25 }
 0x8dc   : > { %v1916_v15 = vpop.permute.xlu0 %1915  ;;  %v1914_v23 = vpop.permute.xlu1 %1913 }
 0x8dd   : > { %v1921_v59 = vsel %vm446_vm0, %v1914_v23, %v1916_v15 }
 0x8de   : > { %v1925_v58 = vadd.f32 %v1921_v59, %v1880_v36 }
 0x8e0   : > { %v1920_v5 = vpop.permute.xlu0 %1919  ;;  %v1918_v57 = vpop.permute.xlu1 %1917  ;;  %v1950_v22 = vadd.f32 %v1945_v35, %v1925_v58 }
 0x8e1   : > { %v1922_v3 = vsel %vm446_vm0, %v1918_v57, %v1920_v5 }
 0x8e2   : > { %v1926_v10 = vadd.f32 %v1922_v3, %v1881_v28 }
 0x8e4   : > { %v1986_v17 = vpop.permute.xlu0 %1985  ;;  %v1984_v21 = vpop.permute.xlu1 %1983  ;;  %v1951_v2 = vadd.f32 %v1947_v26, %v1926_v10 }
 0x8e5   : > { %v1991_v61 = vsel %vm286_vm11, %v1984_v21, %v1986_v17 }
 0x8e6   : > { %v1995_v53 = vadd.f32 %v1991_v61, %v1950_v22 }
 0x8e8   : > { %v1990_v56 = vpop.permute.xlu0 %1989  ;;  %v1988_v16 = vpop.permute.xlu1 %1987 }
 0x8e9   : > { %v1992_v51 = vsel %vm286_vm11, %v1988_v16, %v1990_v56 }
 0x8ea   : > { %v1996_v13 = vadd.f32 %v1992_v51, %v1951_v2 }
 0x8ec   : > { %v2031_v52 = vpop.permute.xlu0 %2030  ;;  %v2029_v19 = vpop.permute.xlu1 %2028 }
 0x8ed   : > { %v2036_v49 = vsel %vm318_vm12, %v2029_v19, %v2031_v52 }
 0x8ee   : > { %v2040_v39 = vadd.f32 %v2036_v49, %v1995_v53 }
 0x8f0   : > { %v2035_v0 = vpop.permute.xlu0 %2034  ;;  %v2033_v24 = vpop.permute.xlu1 %2032 }
 0x8f1   : > { %v2037_v33 = vsel %vm318_vm12, %v2033_v24, %v2035_v0 }
 0x8f2   : > { %v2041_v57 = vadd.f32 %v2037_v33, %v1996_v13 }
 0x8f4   : > { %v2076_v18 = vpop.permute.xlu0 %2075  ;;  %v2074_v42 = vpop.permute.xlu1 %2073 }
 0x8f5   : > { %v2081_v30 = vsel %vm350_vm13, %v2074_v42, %v2076_v18 }
 0x8f6   : > { %v2085_v11 = vadd.f32 %v2081_v30, %v2040_v39 }
 0x8f8   : > { %v2080_v6 = vpop.permute.xlu0 %2079  ;;  %v2078_v29 = vpop.permute.xlu1 %2077 }
 0x8f9   : > { %v2082_v23 = vsel %vm350_vm13, %v2078_v29, %v2080_v6 }
 0x8fa   : > { %v2086_v56 = vadd.f32 %v2082_v23, %v2041_v57 }
 0x8fc   : > { %v2121_v41 = vpop.permute.xlu0 %2120  ;;  %v2119_v43 = vpop.permute.xlu1 %2118 }
 0x8fd   : > { %v2126_v55 = vsel %vm382_vm14, %v2119_v43, %v2121_v41 }
 0x8fe   : > { %v2130_v17 = vadd.f32 %v2126_v55, %v2085_v11 }
 0x900   : > { %v2125_v54 = vpop.permute.xlu0 %2124  ;;  %v2123_v8 = vpop.permute.xlu1 %2122 }
 0x901   : > { %v2127_v21 = vsel %vm382_vm14, %v2123_v8, %v2125_v54 }
 0x902   : > { %v2131_v37 = vadd.f32 %v2127_v21, %v2086_v56 }
 0x904   : > { %v2166_v14 = vpop.permute.xlu0 %2165  ;;  %v2164_v44 = vpop.permute.xlu1 %2163 }
 0x905   : > { %v2171_v5 = vsel %vm414_vm15, %v2164_v44, %v2166_v14 }
 0x906   : > { %v2175_v16 = vadd.f32 %v2171_v5, %v2130_v17 }
 0x908   : > { %v2170_v12 = vpop.permute.xlu0 %2169  ;;  %v2168_v15 = vpop.permute.xlu1 %2167 }
 0x909   : > { %v2172_v0 = vsel %vm414_vm15, %v2168_v15, %v2170_v12 }
 0x90a   : > { %v2176_v42 = vadd.f32 %v2172_v0, %v2131_v37 }
 0x90c   : > { %v2211_v52 = vpop.permute.xlu0 %2210  ;;  %v2209_v19 = vpop.permute.xlu1 %2208 }
 0x90d   : > { %v2216_v24 = vsel %vm446_vm0, %v2209_v19, %v2211_v52 }
 0x90e   : > { %v2220_v18 = vadd.f32 %v2216_v24, %v2175_v16 }
 0x910   : > { %2222 = vst [vmem:[%s203_s30] sm:$0xff] %v2220_v18  ;;  %v2215_v1 = vpop.permute.xlu0 %2214  ;;  %v2213_v48 = vpop.permute.xlu1 %2212 }
 0x911   : > { %v2217_v38 = vsel %vm446_vm0, %v2213_v48, %v2215_v1 }
 0x912   : > { %v2221_v34 = vadd.f32 %v2217_v38, %v2176_v42 }
 0x914   : > { %2223 = vst [vmem:[%s203_s30 + $0x8] sm:$0xff] %v2221_v34 }
 0x915   : > { %2533 = shalt.err (!%p2530_p0)
}
 0x916   : > { %s2534_s8 = scalar_lea.hbm %s3883_s27, 256  ;;  %s2538_s10 = scalar_lea.hbm %s3930_s3, 512 }
 0x917   : > { %p2535_p5 = scmp.ne.s32.totalorder %s3883_s27, %s2534_s8  ;;  %p2539_p4 = scmp.lt.s32.totalorder %s3883_s27, %s3930_s3 }
 0x918   : > { %p2540_p6 = scmp.lt.s32.totalorder %s2538_s10, %s2534_s8 }
 0x919   : > { %p2536_p2 = pnand %p2535_p5, %p4028_p11 }
 0x91a   : > { %p2541_p8 = por %p2540_p6, %p2539_p4 }
 0x91b   : > { %p2537_p1 = pneg %p2536_p2 }
 0x91d   : > { %p2542_p3 = pnand %p2541_p8, %p2537_p1 }
 0x91f   : > { %2545 = shalt.err (!%p2542_p3)
}
 0x920   : > { %s2608_s30 = smov 128  }
 0x921   : > { %2395 = dma.vmem_to_hbm [thread:$0]  (%p4028_p11), %s3877_s23, 256, %s3883_s27, %s2225_s17, %s2608_s30, %s2608_s30, %s2596_s18  }
 0x922 PF: > { %s2253_s20 = sand.u32 1, %s2576_s12   ;;  %p4029_p7 = scmp.ne.s32.totalorder %s3940_s19, 0 }
 0x923   : > { %p4030_p9 = scmp.ge.s32.totalorder %s2588_s15, 2  ;;  %s2254_s28 = scalar_lea.sflag [#allocation5], %s2253_s20 }
 0x925   : > { %p2406_p10 = pnand %p4030_p9, %p4029_p7 }
 0x927   : > { %p2407_p12 = pneg %p2406_p10 }
 0x929   : > { %2571 = dma.done.wait (%p2407_p12), %s2254_s28, 256  }
 0x92a   : > { %2573 = vsyncadd (%p2407_p12), %s2254_s28, 4294967040  ;;  %p17_p13 = scmp.ge.s32.totalorder %s2683_s24, 4   ;;  %s4031_s12 = smov %s2580_s13 }
 0x92b   : > { %s4032_s13 = smov %s2584_s14  ;;  %s4033_s14 = smov %s2703_s5 }
 0x92c   : > { %s4034_s15 = smov %s2683_s24  ;;  %19 = sbr.rel (!%p17_p13) target bundleno = 6 (0x6), region = 81 }
 0x931   :  { %2259 = vsyncpa [#allocation4], 1 }
 0x932   :  { %2261 = vsyncpa [#allocation4 + $0x1], 1 }
 0x933   :  { %2262 = vsyncpa [#allocation7], 1 }
 0x934   :  { %2263 = vsyncpa [#allocation5], 1 }
 0x935   :  { %2265 = vsyncpa [#allocation5 + $0x1], 1 }

</bundles_post_ra>
